<compile_context>
chip_gen: v5e
topology: v5e:2x2
jax: 0.10.0
libtpu: 0.0.40
codegen_flags: <defaults>
</compile_context>

<pallas_src>
import functools

import jax
import jax.numpy as jnp
from jax.experimental import pallas as pl
from jax.experimental.pallas import tpu as pltpu


NEG_INF = -1e30
PARAMS_PER_LAYER = 6  # w_full, asrc_rows, adst_mat, head_mask, bn_scale, bn_shift


# ---------------------------------------------------------------- kernel ----
def gatnet_fused_kernel(*refs, layer_heads, layer_residual):
    n_layers = len(layer_heads)
    it = iter(refs)
    h_ref, adj_ref, emb_w_ref, emb_b_ref = (next(it) for _ in range(4))
    layer_refs = [tuple(next(it) for _ in range(PARAMS_PER_LAYER)) for _ in range(n_layers)]
    w1_ref, b1_ref, w2_ref, b2_ref, w3_ref, b3_ref = (next(it) for _ in range(6))
    o_ref = next(it)

    h = h_ref[0]          # (N, num_atom_type)   current graph of the batch
    adj = adj_ref[0]      # (N, N)  adj[dst, src] in {0, 1}, self-loops included
    # mask bias computed once per graph (reused by every head / layer)
    neg_bias = jnp.where(adj > 0.0, 0.0, NEG_INF)

    # embedding_h  (in_feat_dropout = identity in eval mode)
    h = jnp.dot(h, emb_w_ref[...], preferred_element_type=jnp.float32) + emb_b_ref[...]
    # TODO(synk): h_soap branch (soap=True) not exercised (config soap=False), no concat path needed.

    for li in range(n_layers):
        heads = layer_heads[li]
        wf, asrc, adst, hmask, bn_scale, bn_shift = layer_refs[li]
        h_in = h

        # fused-head projection: single (N, in_dim) @ (in_dim, heads*head_out) matmul
        z = jnp.dot(h, wf[...], preferred_element_type=jnp.float32)

        # per-head attention scores via block-structured matmuls (no reshape, no transpose):
        #   s_dst[n, hd] = a_dst[hd] . z[n, hd-block]      -> (N, heads)
        #   s_src[hd, n] = a_src[hd] . z[n, hd-block]      -> (heads, N)
        s_dst = jnp.dot(z, adst[...], preferred_element_type=jnp.float32)
        s_src = jax.lax.dot_general(asrc[...], z, (((1,), (1,)), ((), ())),
                                    preferred_element_type=jnp.float32)

        hout = jnp.zeros_like(z)
        for hd in range(heads):
            sc = s_dst[:, hd:hd + 1] + s_src[hd:hd + 1, :]       # (N_dst, N_src)
            sc = jnp.where(sc > 0, sc, 0.01 * sc)                # F.leaky_relu default slope
            sc = sc + neg_bias                                   # masked edges -> -1e30
            m = jnp.max(sc, axis=-1, keepdims=True)
            p = jnp.exp(sc - m)                                  # masked entries underflow to 0
            alpha = p * pl.reciprocal(jnp.sum(p, axis=-1, keepdims=True), approx=True)
            # each head contributes only to its own contiguous lane slice of hout (no concat)
            zh = z if heads == 1 else z * hmask[hd:hd + 1, :]
            hout = hout + jnp.dot(alpha, zh, preferred_element_type=jnp.float32)

        # BatchNorm1d (eval running stats, folded into one affine) + ELU(alpha=1)
        hout = hout * bn_scale[...] + bn_shift[...]
        hout = jnp.where(hout > 0, hout, jnp.exp(jnp.minimum(hout, 0.0)) - 1.0)
        # attention / feature dropout: identity in eval mode

        if layer_residual[li]:
            hout = hout + h_in
        h = hout

    # 'mean' readout over nodes, then MLPReadout: out_dim -> out_dim//2 -> out_dim//4 -> 1
    hg = jnp.mean(h, axis=0, keepdims=True)                      # (1, out_dim)
    y = jnp.maximum(
        jnp.dot(hg, w1_ref[...], preferred_element_type=jnp.float32) + b1_ref[...], 0.0)
    y = jnp.maximum(
        jnp.dot(y, w2_ref[...], preferred_element_type=jnp.float32) + b2_ref[...], 0.0)
    y = jnp.dot(y, w3_ref[...], preferred_element_type=jnp.float32) + b3_ref[...]
    o_ref[0] = y


# ---------------------------------------------------------------- wrapper ----
def _const_spec(a):
    nd = a.ndim
    return pl.BlockSpec(a.shape, lambda g, _nd=nd: (0,) * _nd)


def gatnet_forward(h, adj, params):
    """h: (B, N, num_atom_type), adj: (B, N, N) with adj[b, dst, src]=1 for edge src->dst (+ self loops)."""
    B, N, A = h.shape
    layer_heads = tuple(lp["num_heads"] for lp in params["layers"])
    layer_residual = tuple(lp["residual"] for lp in params["layers"])

    flat = [params["emb_w"], params["emb_b"]]
    for lp in params["layers"]:
        flat += [lp["w_full"], lp["asrc_rows"], lp["adst_mat"],
                 lp["head_mask"], lp["bn_scale"], lp["bn_shift"]]
    mlp = params["mlp"]
    flat += [mlp["w1"], mlp["b1"], mlp["w2"], mlp["b2"], mlp["w3"], mlp["b3"]]

    kernel = functools.partial(gatnet_fused_kernel,
                               layer_heads=layer_heads,
                               layer_residual=layer_residual)

    out = pl.pallas_call(
        kernel,
        grid=(B,),
        in_specs=[pl.BlockSpec((1, N, A), lambda g: (g, 0, 0)),
                  pl.BlockSpec((1, N, N), lambda g: (g, 0, 0))]
                 + [_const_spec(a) for a in flat],
        out_specs=pl.BlockSpec((1, 1, 1), lambda g: (g, 0, 0)),
        out_shape=jax.ShapeDtypeStruct((B, 1, 1), jnp.float32),
        compiler_params=pltpu.CompilerParams(dimension_semantics=("parallel",)),
    )(h, adj, *flat)
    return out.reshape(B, 1)


# ---------------------------------------------------------------- params ----
def _block_rows(a):
    """(heads, D) -> (heads, heads*D) with a[hd] placed in block hd (block-diag rows)."""
    heads, d = a.shape
    eye = jnp.eye(heads, dtype=a.dtype)
    return (eye[:, :, None] * a[None, :, :]).reshape(heads, heads * d)


def init_params(key, num_atom_type, hidden_dim, out_dim, n_heads, n_layers):
    k = iter(jax.random.split(key, 64))
    f32 = jnp.float32
    emb_dim = hidden_dim * n_heads
    eps = 1e-5

    params = {
        "emb_w": 0.1 * jax.random.normal(next(k), (num_atom_type, emb_dim), f32),
        "emb_b": jnp.zeros((1, emb_dim), f32),
        "layers": [],
    }

    def make_layer(in_dim, head_out, heads):
        wfc = 0.1 * jax.random.normal(next(k), (heads, in_dim, head_out), f32)
        asrc = 0.1 * jax.random.normal(next(k), (heads, head_out), f32)
        adst = 0.1 * jax.random.normal(next(k), (heads, head_out), f32)
        gamma = jnp.ones((heads, head_out), f32)
        beta = jnp.zeros((heads, head_out), f32)
        mean = jnp.zeros((heads, head_out), f32)   # BN running_mean init
        var = jnp.ones((heads, head_out), f32)     # BN running_var init
        # host-side precompute: fused BN affine + packed fused-head weights
        scale = gamma * jax.lax.rsqrt(var + eps)
        shift = beta - mean * scale
        return {
            "num_heads": heads,
            "head_out": head_out,
            "residual": in_dim == head_out * heads,
            "w_full": jnp.transpose(wfc, (1, 0, 2)).reshape(in_dim, heads * head_out),
            "asrc_rows": _block_rows(asrc),                           # (heads, heads*head_out)
            "adst_mat": _block_rows(adst).T,                          # (heads*head_out, heads)
            "head_mask": _block_rows(jnp.ones((heads, head_out), f32)),
            "bn_scale": scale.reshape(1, heads * head_out),
            "bn_shift": shift.reshape(1, heads * head_out),
        }

    for _ in range(n_layers - 1):
        params["layers"].append(make_layer(emb_dim, hidden_dim, n_heads))
    params["layers"].append(make_layer(emb_dim, out_dim, 1))

    # MLPReadout: out_dim -> out_dim//2 -> out_dim//4 -> 1
    d0, d1, d2 = out_dim, out_dim // 2, out_dim // 4
    params["mlp"] = {
        "w1": 0.1 * jax.random.normal(next(k), (d0, d1), f32),
        "b1": jnp.zeros((1, d1), f32),
        "w2": 0.1 * jax.random.normal(next(k), (d1, d2), f32),
        "b2": jnp.zeros((1, d2), f32),
        "w3": 0.1 * jax.random.normal(next(k), (d2, 1), f32),
        "b3": jnp.zeros((1, 1), f32),
    }
    return params


# ---------------------------------------------------------------- main ----
if __name__ == "__main__":
    # net_params: num_atom_type=8, hidden_dim=8, n_heads=4, out_dim=32, L=3,
    #             readout='mean', batch_norm=True, residual=True, soap=False, dropout=0 (eval)
    NUM_ATOM_TYPE = 8
    HIDDEN_DIM = 8
    N_HEADS = 4
    OUT_DIM = HIDDEN_DIM * N_HEADS  # 32 (residual applies on the final layer too)
    N_LAYERS = 3
    N_NODES = 16
    N_GRAPHS = 4                    # graphs batched on the parallel grid axis

    key = jax.random.PRNGKey(0)
    kh, kadj, kp = jax.random.split(key, 3)

    h = jax.random.normal(kh, (N_GRAPHS, N_NODES, NUM_ATOM_TYPE), jnp.float32)
    # random directed adjacency with self-loops; adj[b, dst, src] = 1 if edge src -> dst
    adj = jax.random.bernoulli(kadj, 0.3, (N_GRAPHS, N_NODES, N_NODES)).astype(jnp.float32)
    adj = jnp.maximum(adj, jnp.eye(N_NODES, dtype=jnp.float32)[None])

    params = init_params(kp, NUM_ATOM_TYPE, HIDDEN_DIM, OUT_DIM, N_HEADS, N_LAYERS)

    out = gatnet_forward(h, adj, params)
    out = jax.block_until_ready(out)
    assert out.shape == (N_GRAPHS, 1) and out.dtype == jnp.float32
    assert bool(jnp.all(jnp.isfinite(out)))
    print("KERNEL_OK")
</pallas_src>

<mosaic_0001>
module attributes {stable_mosaic.version = 11 : i64} {
  func.func @gatnet_fused_kernel(%arg0: i32, %arg1: memref<1x16x8xf32, #tpu.memory_space<vmem>>, %arg2: memref<1x16x16xf32, #tpu.memory_space<vmem>>, %arg3: memref<8x32xf32, #tpu.memory_space<vmem>>, %arg4: memref<1x32xf32, #tpu.memory_space<vmem>>, %arg5: memref<32x32xf32, #tpu.memory_space<vmem>>, %arg6: memref<4x32xf32, #tpu.memory_space<vmem>>, %arg7: memref<32x4xf32, #tpu.memory_space<vmem>>, %arg8: memref<4x32xf32, #tpu.memory_space<vmem>>, %arg9: memref<1x32xf32, #tpu.memory_space<vmem>>, %arg10: memref<1x32xf32, #tpu.memory_space<vmem>>, %arg11: memref<32x32xf32, #tpu.memory_space<vmem>>, %arg12: memref<4x32xf32, #tpu.memory_space<vmem>>, %arg13: memref<32x4xf32, #tpu.memory_space<vmem>>, %arg14: memref<4x32xf32, #tpu.memory_space<vmem>>, %arg15: memref<1x32xf32, #tpu.memory_space<vmem>>, %arg16: memref<1x32xf32, #tpu.memory_space<vmem>>, %arg17: memref<32x32xf32, #tpu.memory_space<vmem>>, %arg18: memref<1x32xf32, #tpu.memory_space<vmem>>, %arg19: memref<32x1xf32, #tpu.memory_space<vmem>>, %arg20: memref<1x32xf32, #tpu.memory_space<vmem>>, %arg21: memref<1x32xf32, #tpu.memory_space<vmem>>, %arg22: memref<1x32xf32, #tpu.memory_space<vmem>>, %arg23: memref<32x16xf32, #tpu.memory_space<vmem>>, %arg24: memref<1x16xf32, #tpu.memory_space<vmem>>, %arg25: memref<16x8xf32, #tpu.memory_space<vmem>>, %arg26: memref<1x8xf32, #tpu.memory_space<vmem>>, %arg27: memref<8x1xf32, #tpu.memory_space<vmem>>, %arg28: memref<1x1xf32, #tpu.memory_space<vmem>>, %arg29: memref<1x1x1xf32, #tpu.memory_space<vmem>>) attributes {dimension_semantics = [#tpu.dimension_semantics<parallel>], iteration_bounds = array<i64: 4>, scalar_prefetch = 0 : i64, scratch_operands = 0 : i64, tpu.core_type = #tpu.core_type<tc>, window_params = [{transform_indices = @transform_0, window_bounds = array<i64: 1, 16, 8>}, {transform_indices = @transform_1, window_bounds = array<i64: 1, 16, 16>}, {pipeline_mode = #tpu.pipeline_mode<synchronous>, transform_indices = @transform_2, window_bounds = array<i64: 8, 32>}, {pipeline_mode = #tpu.pipeline_mode<synchronous>, transform_indices = @transform_3, window_bounds = array<i64: 1, 32>}, {pipeline_mode = #tpu.pipeline_mode<synchronous>, transform_indices = @transform_4, window_bounds = array<i64: 32, 32>}, {pipeline_mode = #tpu.pipeline_mode<synchronous>, transform_indices = @transform_5, window_bounds = array<i64: 4, 32>}, {pipeline_mode = #tpu.pipeline_mode<synchronous>, transform_indices = @transform_6, window_bounds = array<i64: 32, 4>}, {pipeline_mode = #tpu.pipeline_mode<synchronous>, transform_indices = @transform_7, window_bounds = array<i64: 4, 32>}, {pipeline_mode = #tpu.pipeline_mode<synchronous>, transform_indices = @transform_8, window_bounds = array<i64: 1, 32>}, {pipeline_mode = #tpu.pipeline_mode<synchronous>, transform_indices = @transform_9, window_bounds = array<i64: 1, 32>}, {pipeline_mode = #tpu.pipeline_mode<synchronous>, transform_indices = @transform_10, window_bounds = array<i64: 32, 32>}, {pipeline_mode = #tpu.pipeline_mode<synchronous>, transform_indices = @transform_11, window_bounds = array<i64: 4, 32>}, {pipeline_mode = #tpu.pipeline_mode<synchronous>, transform_indices = @transform_12, window_bounds = array<i64: 32, 4>}, {pipeline_mode = #tpu.pipeline_mode<synchronous>, transform_indices = @transform_13, window_bounds = array<i64: 4, 32>}, {pipeline_mode = #tpu.pipeline_mode<synchronous>, transform_indices = @transform_14, window_bounds = array<i64: 1, 32>}, {pipeline_mode = #tpu.pipeline_mode<synchronous>, transform_indices = @transform_15, window_bounds = array<i64: 1, 32>}, {pipeline_mode = #tpu.pipeline_mode<synchronous>, transform_indices = @transform_16, window_bounds = array<i64: 32, 32>}, {pipeline_mode = #tpu.pipeline_mode<synchronous>, transform_indices = @transform_17, window_bounds = array<i64: 1, 32>}, {pipeline_mode = #tpu.pipeline_mode<synchronous>, transform_indices = @transform_18, window_bounds = array<i64: 32, 1>}, {pipeline_mode = #tpu.pipeline_mode<synchronous>, transform_indices = @transform_19, window_bounds = array<i64: 1, 32>}, {pipeline_mode = #tpu.pipeline_mode<synchronous>, transform_indices = @transform_20, window_bounds = array<i64: 1, 32>}, {pipeline_mode = #tpu.pipeline_mode<synchronous>, transform_indices = @transform_21, window_bounds = array<i64: 1, 32>}, {pipeline_mode = #tpu.pipeline_mode<synchronous>, transform_indices = @transform_22, window_bounds = array<i64: 32, 16>}, {pipeline_mode = #tpu.pipeline_mode<synchronous>, transform_indices = @transform_23, window_bounds = array<i64: 1, 16>}, {pipeline_mode = #tpu.pipeline_mode<synchronous>, transform_indices = @transform_24, window_bounds = array<i64: 16, 8>}, {pipeline_mode = #tpu.pipeline_mode<synchronous>, transform_indices = @transform_25, window_bounds = array<i64: 1, 8>}, {pipeline_mode = #tpu.pipeline_mode<synchronous>, transform_indices = @transform_26, window_bounds = array<i64: 8, 1>}, {pipeline_mode = #tpu.pipeline_mode<synchronous>, transform_indices = @transform_27, window_bounds = array<i64: 1, 1>}, {transform_indices = @transform_28, window_bounds = array<i64: 1, 1, 1>}]} {
    %c0 = arith.constant 0 : index
    %c0_0 = arith.constant 0 : index
    %c0_1 = arith.constant 0 : index
    %0 = vector.load %arg1[%c0, %c0_0, %c0_1] : memref<1x16x8xf32, #tpu.memory_space<vmem>>, vector<1x16x8xf32>
    %1 = vector.shape_cast %0 : vector<1x16x8xf32> to vector<16x8xf32>
    %c0_2 = arith.constant 0 : index
    %c0_3 = arith.constant 0 : index
    %c0_4 = arith.constant 0 : index
    %2 = vector.load %arg2[%c0_2, %c0_3, %c0_4] : memref<1x16x16xf32, #tpu.memory_space<vmem>>, vector<1x16x16xf32>
    %3 = vector.shape_cast %2 : vector<1x16x16xf32> to vector<16x16xf32>
    %cst = arith.constant 0.000000e+00 : f32
    %4 = vector.broadcast %cst : f32 to vector<16x16xf32>
    %5 = arith.cmpf ogt, %3, %4 : vector<16x16xf32>
    %cst_5 = arith.constant 0.000000e+00 : f32
    %cst_6 = arith.constant -1.000000e+30 : f32
    %6 = vector.broadcast %cst_5 : f32 to vector<16x16xf32>
    %7 = vector.broadcast %cst_6 : f32 to vector<16x16xf32>
    %8 = arith.select %5, %6, %7 : vector<16x16xi1>, vector<16x16xf32>
    %c0_7 = arith.constant 0 : index
    %c0_8 = arith.constant 0 : index
    %9 = vector.load %arg3[%c0_7, %c0_8] : memref<8x32xf32, #tpu.memory_space<vmem>>, vector<8x32xf32>
    %cst_9 = arith.constant dense<0.000000e+00> : vector<16x32xf32>
    %10 = tpu.matmul %1, %9, %cst_9 {dimension_numbers = #tpu.dot_dimension_numbers<[1], [0], [0], [1], [0, 0, 1, 1], [], []>} : vector<16x8xf32>, vector<8x32xf32>, vector<16x32xf32> -> vector<16x32xf32>
    %c0_10 = arith.constant 0 : index
    %c0_11 = arith.constant 0 : index
    %11 = vector.load %arg4[%c0_10, %c0_11] : memref<1x32xf32, #tpu.memory_space<vmem>>, vector<1x32xf32>
    %12 = vector.broadcast %11 : vector<1x32xf32> to vector<16x32xf32>
    %13 = arith.addf %10, %12 : vector<16x32xf32>
    %c0_12 = arith.constant 0 : index
    %c0_13 = arith.constant 0 : index
    %14 = vector.load %arg5[%c0_12, %c0_13] : memref<32x32xf32, #tpu.memory_space<vmem>>, vector<32x32xf32>
    %cst_14 = arith.constant dense<0.000000e+00> : vector<16x32xf32>
    %15 = tpu.matmul %13, %14, %cst_14 {dimension_numbers = #tpu.dot_dimension_numbers<[1], [0], [0], [1], [0, 0, 1, 1], [], []>} : vector<16x32xf32>, vector<32x32xf32>, vector<16x32xf32> -> vector<16x32xf32>
    %c0_15 = arith.constant 0 : index
    %c0_16 = arith.constant 0 : index
    %16 = vector.load %arg7[%c0_15, %c0_16] : memref<32x4xf32, #tpu.memory_space<vmem>>, vector<32x4xf32>
    %cst_17 = arith.constant dense<0.000000e+00> : vector<16x4xf32>
    %17 = tpu.matmul %15, %16, %cst_17 {dimension_numbers = #tpu.dot_dimension_numbers<[1], [0], [0], [1], [0, 0, 1, 1], [], []>} : vector<16x32xf32>, vector<32x4xf32>, vector<16x4xf32> -> vector<16x4xf32>
    %c0_18 = arith.constant 0 : index
    %c0_19 = arith.constant 0 : index
    %18 = vector.load %arg6[%c0_18, %c0_19] : memref<4x32xf32, #tpu.memory_space<vmem>>, vector<4x32xf32>
    %cst_20 = arith.constant dense<0.000000e+00> : vector<4x16xf32>
    %19 = tpu.matmul %18, %15, %cst_20 {dimension_numbers = #tpu.dot_dimension_numbers<[1], [1], [0], [0], [0, 0, 1, 0], [], []>} : vector<4x32xf32>, vector<16x32xf32>, vector<4x16xf32> -> vector<4x16xf32>
    %cst_21 = arith.constant 0.000000e+00 : f32
    %20 = vector.broadcast %cst_21 : f32 to vector<16x32xf32>
    %21 = vector.extract_strided_slice %17 {offsets = [0, 0], sizes = [16, 1], strides = [1, 1]} : vector<16x4xf32> to vector<16x1xf32>
    %22 = vector.extract_strided_slice %19 {offsets = [0, 0], sizes = [1, 16], strides = [1, 1]} : vector<4x16xf32> to vector<1x16xf32>
    %23 = vector.broadcast %21 : vector<16x1xf32> to vector<16x16xf32>
    %24 = vector.broadcast %22 : vector<1x16xf32> to vector<16x16xf32>
    %25 = arith.addf %23, %24 : vector<16x16xf32>
    %cst_22 = arith.constant 0.000000e+00 : f32
    %26 = vector.broadcast %cst_22 : f32 to vector<16x16xf32>
    %27 = arith.cmpf ogt, %25, %26 : vector<16x16xf32>
    %cst_23 = arith.constant 0.00999999977 : f32
    %28 = vector.broadcast %cst_23 : f32 to vector<16x16xf32>
    %29 = arith.mulf %28, %25 : vector<16x16xf32>
    %30 = arith.select %27, %25, %29 : vector<16x16xi1>, vector<16x16xf32>
    %31 = arith.addf %30, %8 : vector<16x16xf32>
    %cst_24 = arith.constant dense<0xFF800000> : vector<16xf32>
    %32 = vector.multi_reduction <maximumf>, %31, %cst_24 [1] : vector<16x16xf32> to vector<16xf32>
    %33 = vector.shape_cast %32 : vector<16xf32> to vector<16x1xf32>
    %34 = vector.broadcast %33 : vector<16x1xf32> to vector<16x16xf32>
    %35 = arith.subf %31, %34 : vector<16x16xf32>
    %36 = math.exp %35 : vector<16x16xf32>
    %cst_25 = arith.constant dense<0.000000e+00> : vector<16xf32>
    %37 = vector.multi_reduction <add>, %36, %cst_25 [1] : vector<16x16xf32> to vector<16xf32>
    %38 = vector.shape_cast %37 : vector<16xf32> to vector<16x1xf32>
    %39 = tpu.reciprocal %38 {approx = true} : vector<16x1xf32> -> vector<16x1xf32>
    %40 = vector.broadcast %39 : vector<16x1xf32> to vector<16x16xf32>
    %41 = arith.mulf %36, %40 : vector<16x16xf32>
    %c0_26 = arith.constant 0 : index
    %c0_27 = arith.constant 0 : index
    %42 = vector.load %arg8[%c0_26, %c0_27] : memref<4x32xf32, #tpu.memory_space<vmem>>, vector<1x32xf32>
    %43 = vector.broadcast %42 : vector<1x32xf32> to vector<16x32xf32>
    %44 = arith.mulf %15, %43 : vector<16x32xf32>
    %cst_28 = arith.constant dense<0.000000e+00> : vector<16x32xf32>
    %45 = tpu.matmul %41, %44, %cst_28 {dimension_numbers = #tpu.dot_dimension_numbers<[1], [0], [0], [1], [0, 0, 1, 1], [], []>} : vector<16x16xf32>, vector<16x32xf32>, vector<16x32xf32> -> vector<16x32xf32>
    %46 = arith.addf %20, %45 : vector<16x32xf32>
    %47 = vector.extract_strided_slice %17 {offsets = [0, 1], sizes = [16, 1], strides = [1, 1]} : vector<16x4xf32> to vector<16x1xf32>
    %48 = vector.extract_strided_slice %19 {offsets = [1, 0], sizes = [1, 16], strides = [1, 1]} : vector<4x16xf32> to vector<1x16xf32>
    %49 = vector.broadcast %47 : vector<16x1xf32> to vector<16x16xf32>
    %50 = vector.broadcast %48 : vector<1x16xf32> to vector<16x16xf32>
    %51 = arith.addf %49, %50 : vector<16x16xf32>
    %cst_29 = arith.constant 0.000000e+00 : f32
    %52 = vector.broadcast %cst_29 : f32 to vector<16x16xf32>
    %53 = arith.cmpf ogt, %51, %52 : vector<16x16xf32>
    %cst_30 = arith.constant 0.00999999977 : f32
    %54 = vector.broadcast %cst_30 : f32 to vector<16x16xf32>
    %55 = arith.mulf %54, %51 : vector<16x16xf32>
    %56 = arith.select %53, %51, %55 : vector<16x16xi1>, vector<16x16xf32>
    %57 = arith.addf %56, %8 : vector<16x16xf32>
    %cst_31 = arith.constant dense<0xFF800000> : vector<16xf32>
    %58 = vector.multi_reduction <maximumf>, %57, %cst_31 [1] : vector<16x16xf32> to vector<16xf32>
    %59 = vector.shape_cast %58 : vector<16xf32> to vector<16x1xf32>
    %60 = vector.broadcast %59 : vector<16x1xf32> to vector<16x16xf32>
    %61 = arith.subf %57, %60 : vector<16x16xf32>
    %62 = math.exp %61 : vector<16x16xf32>
    %cst_32 = arith.constant dense<0.000000e+00> : vector<16xf32>
    %63 = vector.multi_reduction <add>, %62, %cst_32 [1] : vector<16x16xf32> to vector<16xf32>
    %64 = vector.shape_cast %63 : vector<16xf32> to vector<16x1xf32>
    %65 = tpu.reciprocal %64 {approx = true} : vector<16x1xf32> -> vector<16x1xf32>
    %66 = vector.broadcast %65 : vector<16x1xf32> to vector<16x16xf32>
    %67 = arith.mulf %62, %66 : vector<16x16xf32>
    %c1 = arith.constant 1 : index
    %c0_33 = arith.constant 0 : index
    %68 = vector.load %arg8[%c1, %c0_33] : memref<4x32xf32, #tpu.memory_space<vmem>>, vector<1x32xf32>
    %69 = vector.broadcast %68 : vector<1x32xf32> to vector<16x32xf32>
    %70 = arith.mulf %15, %69 : vector<16x32xf32>
    %cst_34 = arith.constant dense<0.000000e+00> : vector<16x32xf32>
    %71 = tpu.matmul %67, %70, %cst_34 {dimension_numbers = #tpu.dot_dimension_numbers<[1], [0], [0], [1], [0, 0, 1, 1], [], []>} : vector<16x16xf32>, vector<16x32xf32>, vector<16x32xf32> -> vector<16x32xf32>
    %72 = arith.addf %46, %71 : vector<16x32xf32>
    %73 = vector.extract_strided_slice %17 {offsets = [0, 2], sizes = [16, 1], strides = [1, 1]} : vector<16x4xf32> to vector<16x1xf32>
    %74 = vector.extract_strided_slice %19 {offsets = [2, 0], sizes = [1, 16], strides = [1, 1]} : vector<4x16xf32> to vector<1x16xf32>
    %75 = vector.broadcast %73 : vector<16x1xf32> to vector<16x16xf32>
    %76 = vector.broadcast %74 : vector<1x16xf32> to vector<16x16xf32>
    %77 = arith.addf %75, %76 : vector<16x16xf32>
    %cst_35 = arith.constant 0.000000e+00 : f32
    %78 = vector.broadcast %cst_35 : f32 to vector<16x16xf32>
    %79 = arith.cmpf ogt, %77, %78 : vector<16x16xf32>
    %cst_36 = arith.constant 0.00999999977 : f32
    %80 = vector.broadcast %cst_36 : f32 to vector<16x16xf32>
    %81 = arith.mulf %80, %77 : vector<16x16xf32>
    %82 = arith.select %79, %77, %81 : vector<16x16xi1>, vector<16x16xf32>
    %83 = arith.addf %82, %8 : vector<16x16xf32>
    %cst_37 = arith.constant dense<0xFF800000> : vector<16xf32>
    %84 = vector.multi_reduction <maximumf>, %83, %cst_37 [1] : vector<16x16xf32> to vector<16xf32>
    %85 = vector.shape_cast %84 : vector<16xf32> to vector<16x1xf32>
    %86 = vector.broadcast %85 : vector<16x1xf32> to vector<16x16xf32>
    %87 = arith.subf %83, %86 : vector<16x16xf32>
    %88 = math.exp %87 : vector<16x16xf32>
    %cst_38 = arith.constant dense<0.000000e+00> : vector<16xf32>
    %89 = vector.multi_reduction <add>, %88, %cst_38 [1] : vector<16x16xf32> to vector<16xf32>
    %90 = vector.shape_cast %89 : vector<16xf32> to vector<16x1xf32>
    %91 = tpu.reciprocal %90 {approx = true} : vector<16x1xf32> -> vector<16x1xf32>
    %92 = vector.broadcast %91 : vector<16x1xf32> to vector<16x16xf32>
    %93 = arith.mulf %88, %92 : vector<16x16xf32>
    %c2 = arith.constant 2 : index
    %c0_39 = arith.constant 0 : index
    %94 = vector.load %arg8[%c2, %c0_39] : memref<4x32xf32, #tpu.memory_space<vmem>>, vector<1x32xf32>
    %95 = vector.broadcast %94 : vector<1x32xf32> to vector<16x32xf32>
    %96 = arith.mulf %15, %95 : vector<16x32xf32>
    %cst_40 = arith.constant dense<0.000000e+00> : vector<16x32xf32>
    %97 = tpu.matmul %93, %96, %cst_40 {dimension_numbers = #tpu.dot_dimension_numbers<[1], [0], [0], [1], [0, 0, 1, 1], [], []>} : vector<16x16xf32>, vector<16x32xf32>, vector<16x32xf32> -> vector<16x32xf32>
    %98 = arith.addf %72, %97 : vector<16x32xf32>
    %99 = vector.extract_strided_slice %17 {offsets = [0, 3], sizes = [16, 1], strides = [1, 1]} : vector<16x4xf32> to vector<16x1xf32>
    %100 = vector.extract_strided_slice %19 {offsets = [3, 0], sizes = [1, 16], strides = [1, 1]} : vector<4x16xf32> to vector<1x16xf32>
    %101 = vector.broadcast %99 : vector<16x1xf32> to vector<16x16xf32>
    %102 = vector.broadcast %100 : vector<1x16xf32> to vector<16x16xf32>
    %103 = arith.addf %101, %102 : vector<16x16xf32>
    %cst_41 = arith.constant 0.000000e+00 : f32
    %104 = vector.broadcast %cst_41 : f32 to vector<16x16xf32>
    %105 = arith.cmpf ogt, %103, %104 : vector<16x16xf32>
    %cst_42 = arith.constant 0.00999999977 : f32
    %106 = vector.broadcast %cst_42 : f32 to vector<16x16xf32>
    %107 = arith.mulf %106, %103 : vector<16x16xf32>
    %108 = arith.select %105, %103, %107 : vector<16x16xi1>, vector<16x16xf32>
    %109 = arith.addf %108, %8 : vector<16x16xf32>
    %cst_43 = arith.constant dense<0xFF800000> : vector<16xf32>
    %110 = vector.multi_reduction <maximumf>, %109, %cst_43 [1] : vector<16x16xf32> to vector<16xf32>
    %111 = vector.shape_cast %110 : vector<16xf32> to vector<16x1xf32>
    %112 = vector.broadcast %111 : vector<16x1xf32> to vector<16x16xf32>
    %113 = arith.subf %109, %112 : vector<16x16xf32>
    %114 = math.exp %113 : vector<16x16xf32>
    %cst_44 = arith.constant dense<0.000000e+00> : vector<16xf32>
    %115 = vector.multi_reduction <add>, %114, %cst_44 [1] : vector<16x16xf32> to vector<16xf32>
    %116 = vector.shape_cast %115 : vector<16xf32> to vector<16x1xf32>
    %117 = tpu.reciprocal %116 {approx = true} : vector<16x1xf32> -> vector<16x1xf32>
    %118 = vector.broadcast %117 : vector<16x1xf32> to vector<16x16xf32>
    %119 = arith.mulf %114, %118 : vector<16x16xf32>
    %c3 = arith.constant 3 : index
    %c0_45 = arith.constant 0 : index
    %120 = vector.load %arg8[%c3, %c0_45] : memref<4x32xf32, #tpu.memory_space<vmem>>, vector<1x32xf32>
    %121 = vector.broadcast %120 : vector<1x32xf32> to vector<16x32xf32>
    %122 = arith.mulf %15, %121 : vector<16x32xf32>
    %cst_46 = arith.constant dense<0.000000e+00> : vector<16x32xf32>
    %123 = tpu.matmul %119, %122, %cst_46 {dimension_numbers = #tpu.dot_dimension_numbers<[1], [0], [0], [1], [0, 0, 1, 1], [], []>} : vector<16x16xf32>, vector<16x32xf32>, vector<16x32xf32> -> vector<16x32xf32>
    %124 = arith.addf %98, %123 : vector<16x32xf32>
    %c0_47 = arith.constant 0 : index
    %c0_48 = arith.constant 0 : index
    %125 = vector.load %arg9[%c0_47, %c0_48] : memref<1x32xf32, #tpu.memory_space<vmem>>, vector<1x32xf32>
    %126 = vector.broadcast %125 : vector<1x32xf32> to vector<16x32xf32>
    %127 = arith.mulf %124, %126 : vector<16x32xf32>
    %c0_49 = arith.constant 0 : index
    %c0_50 = arith.constant 0 : index
    %128 = vector.load %arg10[%c0_49, %c0_50] : memref<1x32xf32, #tpu.memory_space<vmem>>, vector<1x32xf32>
    %129 = vector.broadcast %128 : vector<1x32xf32> to vector<16x32xf32>
    %130 = arith.addf %127, %129 : vector<16x32xf32>
    %cst_51 = arith.constant 0.000000e+00 : f32
    %131 = vector.broadcast %cst_51 : f32 to vector<16x32xf32>
    %132 = arith.cmpf ogt, %130, %131 : vector<16x32xf32>
    %cst_52 = arith.constant 0.000000e+00 : f32
    %133 = vector.broadcast %cst_52 : f32 to vector<16x32xf32>
    %134 = arith.minimumf %130, %133 : vector<16x32xf32>
    %135 = math.exp %134 : vector<16x32xf32>
    %cst_53 = arith.constant 1.000000e+00 : f32
    %136 = vector.broadcast %cst_53 : f32 to vector<16x32xf32>
    %137 = arith.subf %135, %136 : vector<16x32xf32>
    %138 = arith.select %132, %130, %137 : vector<16x32xi1>, vector<16x32xf32>
    %139 = arith.addf %138, %13 : vector<16x32xf32>
    %c0_54 = arith.constant 0 : index
    %c0_55 = arith.constant 0 : index
    %140 = vector.load %arg11[%c0_54, %c0_55] : memref<32x32xf32, #tpu.memory_space<vmem>>, vector<32x32xf32>
    %cst_56 = arith.constant dense<0.000000e+00> : vector<16x32xf32>
    %141 = tpu.matmul %139, %140, %cst_56 {dimension_numbers = #tpu.dot_dimension_numbers<[1], [0], [0], [1], [0, 0, 1, 1], [], []>} : vector<16x32xf32>, vector<32x32xf32>, vector<16x32xf32> -> vector<16x32xf32>
    %c0_57 = arith.constant 0 : index
    %c0_58 = arith.constant 0 : index
    %142 = vector.load %arg13[%c0_57, %c0_58] : memref<32x4xf32, #tpu.memory_space<vmem>>, vector<32x4xf32>
    %cst_59 = arith.constant dense<0.000000e+00> : vector<16x4xf32>
    %143 = tpu.matmul %141, %142, %cst_59 {dimension_numbers = #tpu.dot_dimension_numbers<[1], [0], [0], [1], [0, 0, 1, 1], [], []>} : vector<16x32xf32>, vector<32x4xf32>, vector<16x4xf32> -> vector<16x4xf32>
    %c0_60 = arith.constant 0 : index
    %c0_61 = arith.constant 0 : index
    %144 = vector.load %arg12[%c0_60, %c0_61] : memref<4x32xf32, #tpu.memory_space<vmem>>, vector<4x32xf32>
    %cst_62 = arith.constant dense<0.000000e+00> : vector<4x16xf32>
    %145 = tpu.matmul %144, %141, %cst_62 {dimension_numbers = #tpu.dot_dimension_numbers<[1], [1], [0], [0], [0, 0, 1, 0], [], []>} : vector<4x32xf32>, vector<16x32xf32>, vector<4x16xf32> -> vector<4x16xf32>
    %cst_63 = arith.constant 0.000000e+00 : f32
    %146 = vector.broadcast %cst_63 : f32 to vector<16x32xf32>
    %147 = vector.extract_strided_slice %143 {offsets = [0, 0], sizes = [16, 1], strides = [1, 1]} : vector<16x4xf32> to vector<16x1xf32>
    %148 = vector.extract_strided_slice %145 {offsets = [0, 0], sizes = [1, 16], strides = [1, 1]} : vector<4x16xf32> to vector<1x16xf32>
    %149 = vector.broadcast %147 : vector<16x1xf32> to vector<16x16xf32>
    %150 = vector.broadcast %148 : vector<1x16xf32> to vector<16x16xf32>
    %151 = arith.addf %149, %150 : vector<16x16xf32>
    %cst_64 = arith.constant 0.000000e+00 : f32
    %152 = vector.broadcast %cst_64 : f32 to vector<16x16xf32>
    %153 = arith.cmpf ogt, %151, %152 : vector<16x16xf32>
    %cst_65 = arith.constant 0.00999999977 : f32
    %154 = vector.broadcast %cst_65 : f32 to vector<16x16xf32>
    %155 = arith.mulf %154, %151 : vector<16x16xf32>
    %156 = arith.select %153, %151, %155 : vector<16x16xi1>, vector<16x16xf32>
    %157 = arith.addf %156, %8 : vector<16x16xf32>
    %cst_66 = arith.constant dense<0xFF800000> : vector<16xf32>
    %158 = vector.multi_reduction <maximumf>, %157, %cst_66 [1] : vector<16x16xf32> to vector<16xf32>
    %159 = vector.shape_cast %158 : vector<16xf32> to vector<16x1xf32>
    %160 = vector.broadcast %159 : vector<16x1xf32> to vector<16x16xf32>
    %161 = arith.subf %157, %160 : vector<16x16xf32>
    %162 = math.exp %161 : vector<16x16xf32>
    %cst_67 = arith.constant dense<0.000000e+00> : vector<16xf32>
    %163 = vector.multi_reduction <add>, %162, %cst_67 [1] : vector<16x16xf32> to vector<16xf32>
    %164 = vector.shape_cast %163 : vector<16xf32> to vector<16x1xf32>
    %165 = tpu.reciprocal %164 {approx = true} : vector<16x1xf32> -> vector<16x1xf32>
    %166 = vector.broadcast %165 : vector<16x1xf32> to vector<16x16xf32>
    %167 = arith.mulf %162, %166 : vector<16x16xf32>
    %c0_68 = arith.constant 0 : index
    %c0_69 = arith.constant 0 : index
    %168 = vector.load %arg14[%c0_68, %c0_69] : memref<4x32xf32, #tpu.memory_space<vmem>>, vector<1x32xf32>
    %169 = vector.broadcast %168 : vector<1x32xf32> to vector<16x32xf32>
    %170 = arith.mulf %141, %169 : vector<16x32xf32>
    %cst_70 = arith.constant dense<0.000000e+00> : vector<16x32xf32>
    %171 = tpu.matmul %167, %170, %cst_70 {dimension_numbers = #tpu.dot_dimension_numbers<[1], [0], [0], [1], [0, 0, 1, 1], [], []>} : vector<16x16xf32>, vector<16x32xf32>, vector<16x32xf32> -> vector<16x32xf32>
    %172 = arith.addf %146, %171 : vector<16x32xf32>
    %173 = vector.extract_strided_slice %143 {offsets = [0, 1], sizes = [16, 1], strides = [1, 1]} : vector<16x4xf32> to vector<16x1xf32>
    %174 = vector.extract_strided_slice %145 {offsets = [1, 0], sizes = [1, 16], strides = [1, 1]} : vector<4x16xf32> to vector<1x16xf32>
    %175 = vector.broadcast %173 : vector<16x1xf32> to vector<16x16xf32>
    %176 = vector.broadcast %174 : vector<1x16xf32> to vector<16x16xf32>
    %177 = arith.addf %175, %176 : vector<16x16xf32>
    %cst_71 = arith.constant 0.000000e+00 : f32
    %178 = vector.broadcast %cst_71 : f32 to vector<16x16xf32>
    %179 = arith.cmpf ogt, %177, %178 : vector<16x16xf32>
    %cst_72 = arith.constant 0.00999999977 : f32
    %180 = vector.broadcast %cst_72 : f32 to vector<16x16xf32>
    %181 = arith.mulf %180, %177 : vector<16x16xf32>
    %182 = arith.select %179, %177, %181 : vector<16x16xi1>, vector<16x16xf32>
    %183 = arith.addf %182, %8 : vector<16x16xf32>
    %cst_73 = arith.constant dense<0xFF800000> : vector<16xf32>
    %184 = vector.multi_reduction <maximumf>, %183, %cst_73 [1] : vector<16x16xf32> to vector<16xf32>
    %185 = vector.shape_cast %184 : vector<16xf32> to vector<16x1xf32>
    %186 = vector.broadcast %185 : vector<16x1xf32> to vector<16x16xf32>
    %187 = arith.subf %183, %186 : vector<16x16xf32>
    %188 = math.exp %187 : vector<16x16xf32>
    %cst_74 = arith.constant dense<0.000000e+00> : vector<16xf32>
    %189 = vector.multi_reduction <add>, %188, %cst_74 [1] : vector<16x16xf32> to vector<16xf32>
    %190 = vector.shape_cast %189 : vector<16xf32> to vector<16x1xf32>
    %191 = tpu.reciprocal %190 {approx = true} : vector<16x1xf32> -> vector<16x1xf32>
    %192 = vector.broadcast %191 : vector<16x1xf32> to vector<16x16xf32>
    %193 = arith.mulf %188, %192 : vector<16x16xf32>
    %c1_75 = arith.constant 1 : index
    %c0_76 = arith.constant 0 : index
    %194 = vector.load %arg14[%c1_75, %c0_76] : memref<4x32xf32, #tpu.memory_space<vmem>>, vector<1x32xf32>
    %195 = vector.broadcast %194 : vector<1x32xf32> to vector<16x32xf32>
    %196 = arith.mulf %141, %195 : vector<16x32xf32>
    %cst_77 = arith.constant dense<0.000000e+00> : vector<16x32xf32>
    %197 = tpu.matmul %193, %196, %cst_77 {dimension_numbers = #tpu.dot_dimension_numbers<[1], [0], [0], [1], [0, 0, 1, 1], [], []>} : vector<16x16xf32>, vector<16x32xf32>, vector<16x32xf32> -> vector<16x32xf32>
    %198 = arith.addf %172, %197 : vector<16x32xf32>
    %199 = vector.extract_strided_slice %143 {offsets = [0, 2], sizes = [16, 1], strides = [1, 1]} : vector<16x4xf32> to vector<16x1xf32>
    %200 = vector.extract_strided_slice %145 {offsets = [2, 0], sizes = [1, 16], strides = [1, 1]} : vector<4x16xf32> to vector<1x16xf32>
    %201 = vector.broadcast %199 : vector<16x1xf32> to vector<16x16xf32>
    %202 = vector.broadcast %200 : vector<1x16xf32> to vector<16x16xf32>
    %203 = arith.addf %201, %202 : vector<16x16xf32>
    %cst_78 = arith.constant 0.000000e+00 : f32
    %204 = vector.broadcast %cst_78 : f32 to vector<16x16xf32>
    %205 = arith.cmpf ogt, %203, %204 : vector<16x16xf32>
    %cst_79 = arith.constant 0.00999999977 : f32
    %206 = vector.broadcast %cst_79 : f32 to vector<16x16xf32>
    %207 = arith.mulf %206, %203 : vector<16x16xf32>
    %208 = arith.select %205, %203, %207 : vector<16x16xi1>, vector<16x16xf32>
    %209 = arith.addf %208, %8 : vector<16x16xf32>
    %cst_80 = arith.constant dense<0xFF800000> : vector<16xf32>
    %210 = vector.multi_reduction <maximumf>, %209, %cst_80 [1] : vector<16x16xf32> to vector<16xf32>
    %211 = vector.shape_cast %210 : vector<16xf32> to vector<16x1xf32>
    %212 = vector.broadcast %211 : vector<16x1xf32> to vector<16x16xf32>
    %213 = arith.subf %209, %212 : vector<16x16xf32>
    %214 = math.exp %213 : vector<16x16xf32>
    %cst_81 = arith.constant dense<0.000000e+00> : vector<16xf32>
    %215 = vector.multi_reduction <add>, %214, %cst_81 [1] : vector<16x16xf32> to vector<16xf32>
    %216 = vector.shape_cast %215 : vector<16xf32> to vector<16x1xf32>
    %217 = tpu.reciprocal %216 {approx = true} : vector<16x1xf32> -> vector<16x1xf32>
    %218 = vector.broadcast %217 : vector<16x1xf32> to vector<16x16xf32>
    %219 = arith.mulf %214, %218 : vector<16x16xf32>
    %c2_82 = arith.constant 2 : index
    %c0_83 = arith.constant 0 : index
    %220 = vector.load %arg14[%c2_82, %c0_83] : memref<4x32xf32, #tpu.memory_space<vmem>>, vector<1x32xf32>
    %221 = vector.broadcast %220 : vector<1x32xf32> to vector<16x32xf32>
    %222 = arith.mulf %141, %221 : vector<16x32xf32>
    %cst_84 = arith.constant dense<0.000000e+00> : vector<16x32xf32>
    %223 = tpu.matmul %219, %222, %cst_84 {dimension_numbers = #tpu.dot_dimension_numbers<[1], [0], [0], [1], [0, 0, 1, 1], [], []>} : vector<16x16xf32>, vector<16x32xf32>, vector<16x32xf32> -> vector<16x32xf32>
    %224 = arith.addf %198, %223 : vector<16x32xf32>
    %225 = vector.extract_strided_slice %143 {offsets = [0, 3], sizes = [16, 1], strides = [1, 1]} : vector<16x4xf32> to vector<16x1xf32>
    %226 = vector.extract_strided_slice %145 {offsets = [3, 0], sizes = [1, 16], strides = [1, 1]} : vector<4x16xf32> to vector<1x16xf32>
    %227 = vector.broadcast %225 : vector<16x1xf32> to vector<16x16xf32>
    %228 = vector.broadcast %226 : vector<1x16xf32> to vector<16x16xf32>
    %229 = arith.addf %227, %228 : vector<16x16xf32>
    %cst_85 = arith.constant 0.000000e+00 : f32
    %230 = vector.broadcast %cst_85 : f32 to vector<16x16xf32>
    %231 = arith.cmpf ogt, %229, %230 : vector<16x16xf32>
    %cst_86 = arith.constant 0.00999999977 : f32
    %232 = vector.broadcast %cst_86 : f32 to vector<16x16xf32>
    %233 = arith.mulf %232, %229 : vector<16x16xf32>
    %234 = arith.select %231, %229, %233 : vector<16x16xi1>, vector<16x16xf32>
    %235 = arith.addf %234, %8 : vector<16x16xf32>
    %cst_87 = arith.constant dense<0xFF800000> : vector<16xf32>
    %236 = vector.multi_reduction <maximumf>, %235, %cst_87 [1] : vector<16x16xf32> to vector<16xf32>
    %237 = vector.shape_cast %236 : vector<16xf32> to vector<16x1xf32>
    %238 = vector.broadcast %237 : vector<16x1xf32> to vector<16x16xf32>
    %239 = arith.subf %235, %238 : vector<16x16xf32>
    %240 = math.exp %239 : vector<16x16xf32>
    %cst_88 = arith.constant dense<0.000000e+00> : vector<16xf32>
    %241 = vector.multi_reduction <add>, %240, %cst_88 [1] : vector<16x16xf32> to vector<16xf32>
    %242 = vector.shape_cast %241 : vector<16xf32> to vector<16x1xf32>
    %243 = tpu.reciprocal %242 {approx = true} : vector<16x1xf32> -> vector<16x1xf32>
    %244 = vector.broadcast %243 : vector<16x1xf32> to vector<16x16xf32>
    %245 = arith.mulf %240, %244 : vector<16x16xf32>
    %c3_89 = arith.constant 3 : index
    %c0_90 = arith.constant 0 : index
    %246 = vector.load %arg14[%c3_89, %c0_90] : memref<4x32xf32, #tpu.memory_space<vmem>>, vector<1x32xf32>
    %247 = vector.broadcast %246 : vector<1x32xf32> to vector<16x32xf32>
    %248 = arith.mulf %141, %247 : vector<16x32xf32>
    %cst_91 = arith.constant dense<0.000000e+00> : vector<16x32xf32>
    %249 = tpu.matmul %245, %248, %cst_91 {dimension_numbers = #tpu.dot_dimension_numbers<[1], [0], [0], [1], [0, 0, 1, 1], [], []>} : vector<16x16xf32>, vector<16x32xf32>, vector<16x32xf32> -> vector<16x32xf32>
    %250 = arith.addf %224, %249 : vector<16x32xf32>
    %c0_92 = arith.constant 0 : index
    %c0_93 = arith.constant 0 : index
    %251 = vector.load %arg15[%c0_92, %c0_93] : memref<1x32xf32, #tpu.memory_space<vmem>>, vector<1x32xf32>
    %252 = vector.broadcast %251 : vector<1x32xf32> to vector<16x32xf32>
    %253 = arith.mulf %250, %252 : vector<16x32xf32>
    %c0_94 = arith.constant 0 : index
    %c0_95 = arith.constant 0 : index
    %254 = vector.load %arg16[%c0_94, %c0_95] : memref<1x32xf32, #tpu.memory_space<vmem>>, vector<1x32xf32>
    %255 = vector.broadcast %254 : vector<1x32xf32> to vector<16x32xf32>
    %256 = arith.addf %253, %255 : vector<16x32xf32>
    %cst_96 = arith.constant 0.000000e+00 : f32
    %257 = vector.broadcast %cst_96 : f32 to vector<16x32xf32>
    %258 = arith.cmpf ogt, %256, %257 : vector<16x32xf32>
    %cst_97 = arith.constant 0.000000e+00 : f32
    %259 = vector.broadcast %cst_97 : f32 to vector<16x32xf32>
    %260 = arith.minimumf %256, %259 : vector<16x32xf32>
    %261 = math.exp %260 : vector<16x32xf32>
    %cst_98 = arith.constant 1.000000e+00 : f32
    %262 = vector.broadcast %cst_98 : f32 to vector<16x32xf32>
    %263 = arith.subf %261, %262 : vector<16x32xf32>
    %264 = arith.select %258, %256, %263 : vector<16x32xi1>, vector<16x32xf32>
    %265 = arith.addf %264, %139 : vector<16x32xf32>
    %c0_99 = arith.constant 0 : index
    %c0_100 = arith.constant 0 : index
    %266 = vector.load %arg17[%c0_99, %c0_100] : memref<32x32xf32, #tpu.memory_space<vmem>>, vector<32x32xf32>
    %cst_101 = arith.constant dense<0.000000e+00> : vector<16x32xf32>
    %267 = tpu.matmul %265, %266, %cst_101 {dimension_numbers = #tpu.dot_dimension_numbers<[1], [0], [0], [1], [0, 0, 1, 1], [], []>} : vector<16x32xf32>, vector<32x32xf32>, vector<16x32xf32> -> vector<16x32xf32>
    %c0_102 = arith.constant 0 : index
    %c0_103 = arith.constant 0 : index
    %268 = vector.load %arg19[%c0_102, %c0_103] : memref<32x1xf32, #tpu.memory_space<vmem>>, vector<32x1xf32>
    %cst_104 = arith.constant dense<0.000000e+00> : vector<16x1xf32>
    %269 = tpu.matmul %267, %268, %cst_104 {dimension_numbers = #tpu.dot_dimension_numbers<[1], [0], [0], [1], [0, 0, 1, 1], [], []>} : vector<16x32xf32>, vector<32x1xf32>, vector<16x1xf32> -> vector<16x1xf32>
    %c0_105 = arith.constant 0 : index
    %c0_106 = arith.constant 0 : index
    %270 = vector.load %arg18[%c0_105, %c0_106] : memref<1x32xf32, #tpu.memory_space<vmem>>, vector<1x32xf32>
    %cst_107 = arith.constant dense<0.000000e+00> : vector<1x16xf32>
    %271 = tpu.matmul %270, %267, %cst_107 {dimension_numbers = #tpu.dot_dimension_numbers<[1], [1], [0], [0], [0, 0, 1, 0], [], []>} : vector<1x32xf32>, vector<16x32xf32>, vector<1x16xf32> -> vector<1x16xf32>
    %cst_108 = arith.constant 0.000000e+00 : f32
    %272 = vector.broadcast %cst_108 : f32 to vector<16x32xf32>
    %273 = vector.broadcast %269 : vector<16x1xf32> to vector<16x16xf32>
    %274 = vector.broadcast %271 : vector<1x16xf32> to vector<16x16xf32>
    %275 = arith.addf %273, %274 : vector<16x16xf32>
    %cst_109 = arith.constant 0.000000e+00 : f32
    %276 = vector.broadcast %cst_109 : f32 to vector<16x16xf32>
    %277 = arith.cmpf ogt, %275, %276 : vector<16x16xf32>
    %cst_110 = arith.constant 0.00999999977 : f32
    %278 = vector.broadcast %cst_110 : f32 to vector<16x16xf32>
    %279 = arith.mulf %278, %275 : vector<16x16xf32>
    %280 = arith.select %277, %275, %279 : vector<16x16xi1>, vector<16x16xf32>
    %281 = arith.addf %280, %8 : vector<16x16xf32>
    %cst_111 = arith.constant dense<0xFF800000> : vector<16xf32>
    %282 = vector.multi_reduction <maximumf>, %281, %cst_111 [1] : vector<16x16xf32> to vector<16xf32>
    %283 = vector.shape_cast %282 : vector<16xf32> to vector<16x1xf32>
    %284 = vector.broadcast %283 : vector<16x1xf32> to vector<16x16xf32>
    %285 = arith.subf %281, %284 : vector<16x16xf32>
    %286 = math.exp %285 : vector<16x16xf32>
    %cst_112 = arith.constant dense<0.000000e+00> : vector<16xf32>
    %287 = vector.multi_reduction <add>, %286, %cst_112 [1] : vector<16x16xf32> to vector<16xf32>
    %288 = vector.shape_cast %287 : vector<16xf32> to vector<16x1xf32>
    %289 = tpu.reciprocal %288 {approx = true} : vector<16x1xf32> -> vector<16x1xf32>
    %290 = vector.broadcast %289 : vector<16x1xf32> to vector<16x16xf32>
    %291 = arith.mulf %286, %290 : vector<16x16xf32>
    %cst_113 = arith.constant dense<0.000000e+00> : vector<16x32xf32>
    %292 = tpu.matmul %291, %267, %cst_113 {dimension_numbers = #tpu.dot_dimension_numbers<[1], [0], [0], [1], [0, 0, 1, 1], [], []>} : vector<16x16xf32>, vector<16x32xf32>, vector<16x32xf32> -> vector<16x32xf32>
    %293 = arith.addf %272, %292 : vector<16x32xf32>
    %c0_114 = arith.constant 0 : index
    %c0_115 = arith.constant 0 : index
    %294 = vector.load %arg21[%c0_114, %c0_115] : memref<1x32xf32, #tpu.memory_space<vmem>>, vector<1x32xf32>
    %295 = vector.broadcast %294 : vector<1x32xf32> to vector<16x32xf32>
    %296 = arith.mulf %293, %295 : vector<16x32xf32>
    %c0_116 = arith.constant 0 : index
    %c0_117 = arith.constant 0 : index
    %297 = vector.load %arg22[%c0_116, %c0_117] : memref<1x32xf32, #tpu.memory_space<vmem>>, vector<1x32xf32>
    %298 = vector.broadcast %297 : vector<1x32xf32> to vector<16x32xf32>
    %299 = arith.addf %296, %298 : vector<16x32xf32>
    %cst_118 = arith.constant 0.000000e+00 : f32
    %300 = vector.broadcast %cst_118 : f32 to vector<16x32xf32>
    %301 = arith.cmpf ogt, %299, %300 : vector<16x32xf32>
    %cst_119 = arith.constant 0.000000e+00 : f32
    %302 = vector.broadcast %cst_119 : f32 to vector<16x32xf32>
    %303 = arith.minimumf %299, %302 : vector<16x32xf32>
    %304 = math.exp %303 : vector<16x32xf32>
    %cst_120 = arith.constant 1.000000e+00 : f32
    %305 = vector.broadcast %cst_120 : f32 to vector<16x32xf32>
    %306 = arith.subf %304, %305 : vector<16x32xf32>
    %307 = arith.select %301, %299, %306 : vector<16x32xi1>, vector<16x32xf32>
    %308 = arith.addf %307, %265 : vector<16x32xf32>
    %cst_121 = arith.constant dense<0.000000e+00> : vector<32xf32>
    %309 = vector.multi_reduction <add>, %308, %cst_121 [0] : vector<16x32xf32> to vector<32xf32>
    %310 = vector.shape_cast %309 : vector<32xf32> to vector<1x32xf32>
    %cst_122 = arith.constant 1.600000e+01 : f32
    %311 = vector.broadcast %cst_122 : f32 to vector<1x32xf32>
    %312 = arith.divf %310, %311 : vector<1x32xf32>
    %c0_123 = arith.constant 0 : index
    %c0_124 = arith.constant 0 : index
    %313 = vector.load %arg23[%c0_123, %c0_124] : memref<32x16xf32, #tpu.memory_space<vmem>>, vector<32x16xf32>
    %cst_125 = arith.constant dense<0.000000e+00> : vector<1x16xf32>
    %314 = tpu.matmul %312, %313, %cst_125 {dimension_numbers = #tpu.dot_dimension_numbers<[1], [0], [0], [1], [0, 0, 1, 1], [], []>} : vector<1x32xf32>, vector<32x16xf32>, vector<1x16xf32> -> vector<1x16xf32>
    %c0_126 = arith.constant 0 : index
    %c0_127 = arith.constant 0 : index
    %315 = vector.load %arg24[%c0_126, %c0_127] : memref<1x16xf32, #tpu.memory_space<vmem>>, vector<1x16xf32>
    %316 = arith.addf %314, %315 : vector<1x16xf32>
    %cst_128 = arith.constant 0.000000e+00 : f32
    %317 = vector.broadcast %cst_128 : f32 to vector<1x16xf32>
    %318 = arith.maximumf %316, %317 : vector<1x16xf32>
    %c0_129 = arith.constant 0 : index
    %c0_130 = arith.constant 0 : index
    %319 = vector.load %arg25[%c0_129, %c0_130] : memref<16x8xf32, #tpu.memory_space<vmem>>, vector<16x8xf32>
    %cst_131 = arith.constant dense<0.000000e+00> : vector<1x8xf32>
    %320 = tpu.matmul %318, %319, %cst_131 {dimension_numbers = #tpu.dot_dimension_numbers<[1], [0], [0], [1], [0, 0, 1, 1], [], []>} : vector<1x16xf32>, vector<16x8xf32>, vector<1x8xf32> -> vector<1x8xf32>
    %c0_132 = arith.constant 0 : index
    %c0_133 = arith.constant 0 : index
    %321 = vector.load %arg26[%c0_132, %c0_133] : memref<1x8xf32, #tpu.memory_space<vmem>>, vector<1x8xf32>
    %322 = arith.addf %320, %321 : vector<1x8xf32>
    %cst_134 = arith.constant 0.000000e+00 : f32
    %323 = vector.broadcast %cst_134 : f32 to vector<1x8xf32>
    %324 = arith.maximumf %322, %323 : vector<1x8xf32>
    %c0_135 = arith.constant 0 : index
    %c0_136 = arith.constant 0 : index
    %325 = vector.load %arg27[%c0_135, %c0_136] : memref<8x1xf32, #tpu.memory_space<vmem>>, vector<8x1xf32>
    %cst_137 = arith.constant dense<0.000000e+00> : vector<1x1xf32>
    %326 = tpu.matmul %324, %325, %cst_137 {dimension_numbers = #tpu.dot_dimension_numbers<[1], [0], [0], [1], [0, 0, 1, 1], [], []>} : vector<1x8xf32>, vector<8x1xf32>, vector<1x1xf32> -> vector<1x1xf32>
    %c0_138 = arith.constant 0 : index
    %c0_139 = arith.constant 0 : index
    %327 = vector.load %arg28[%c0_138, %c0_139] : memref<1x1xf32, #tpu.memory_space<vmem>>, vector<1x1xf32>
    %328 = arith.addf %326, %327 : vector<1x1xf32>
    %c0_140 = arith.constant 0 : index
    %c0_141 = arith.constant 0 : index
    %c0_142 = arith.constant 0 : index
    %329 = vector.load %arg29[%c0_140, %c0_141, %c0_142] : memref<1x1x1xf32, #tpu.memory_space<vmem>>, vector<1x1x1xf32>
    %330 = vector.shape_cast %329 : vector<1x1x1xf32> to vector<1x1xf32>
    %331 = vector.shape_cast %328 : vector<1x1xf32> to vector<1x1x1xf32>
    tpu.vector_store %arg29[%c0_140, %c0_141, %c0_142], %331 {strides = array<i32>} : memref<1x1x1xf32, #tpu.memory_space<vmem>>, vector<1x1x1xf32>,
    return
  }
  func.func @transform_0(%arg0: i32) -> (i32, i32, i32) {
    %c0_i32 = arith.constant 0 : i32
    %c0_i32_0 = arith.constant 0 : i32
    %c0_i32_1 = arith.constant 0 : i32
    return %arg0, %c0_i32, %c0_i32_0 : i32, i32, i32
  }
  func.func @transform_1(%arg0: i32) -> (i32, i32, i32) {
    %c0_i32 = arith.constant 0 : i32
    %c0_i32_0 = arith.constant 0 : i32
    %c0_i32_1 = arith.constant 0 : i32
    return %arg0, %c0_i32, %c0_i32_0 : i32, i32, i32
  }
  func.func @transform_2(%arg0: i32) -> (i32, i32) {
    %c0_i32 = arith.constant 0 : i32
    %c0_i32_0 = arith.constant 0 : i32
    %c0_i32_1 = arith.constant 0 : i32
    return %c0_i32, %c0_i32_0 : i32, i32
  }
  func.func @transform_3(%arg0: i32) -> (i32, i32) {
    %c0_i32 = arith.constant 0 : i32
    %c0_i32_0 = arith.constant 0 : i32
    %c0_i32_1 = arith.constant 0 : i32
    return %c0_i32, %c0_i32_0 : i32, i32
  }
  func.func @transform_4(%arg0: i32) -> (i32, i32) {
    %c0_i32 = arith.constant 0 : i32
    %c0_i32_0 = arith.constant 0 : i32
    %c0_i32_1 = arith.constant 0 : i32
    return %c0_i32, %c0_i32_0 : i32, i32
  }
  func.func @transform_5(%arg0: i32) -> (i32, i32) {
    %c0_i32 = arith.constant 0 : i32
    %c0_i32_0 = arith.constant 0 : i32
    %c0_i32_1 = arith.constant 0 : i32
    return %c0_i32, %c0_i32_0 : i32, i32
  }
  func.func @transform_6(%arg0: i32) -> (i32, i32) {
    %c0_i32 = arith.constant 0 : i32
    %c0_i32_0 = arith.constant 0 : i32
    %c0_i32_1 = arith.constant 0 : i32
    return %c0_i32, %c0_i32_0 : i32, i32
  }
  func.func @transform_7(%arg0: i32) -> (i32, i32) {
    %c0_i32 = arith.constant 0 : i32
    %c0_i32_0 = arith.constant 0 : i32
    %c0_i32_1 = arith.constant 0 : i32
    return %c0_i32, %c0_i32_0 : i32, i32
  }
  func.func @transform_8(%arg0: i32) -> (i32, i32) {
    %c0_i32 = arith.constant 0 : i32
    %c0_i32_0 = arith.constant 0 : i32
    %c0_i32_1 = arith.constant 0 : i32
    return %c0_i32, %c0_i32_0 : i32, i32
  }
  func.func @transform_9(%arg0: i32) -> (i32, i32) {
    %c0_i32 = arith.constant 0 : i32
    %c0_i32_0 = arith.constant 0 : i32
    %c0_i32_1 = arith.constant 0 : i32
    return %c0_i32, %c0_i32_0 : i32, i32
  }
  func.func @transform_10(%arg0: i32) -> (i32, i32) {
    %c0_i32 = arith.constant 0 : i32
    %c0_i32_0 = arith.constant 0 : i32
    %c0_i32_1 = arith.constant 0 : i32
    return %c0_i32, %c0_i32_0 : i32, i32
  }
  func.func @transform_11(%arg0: i32) -> (i32, i32) {
    %c0_i32 = arith.constant 0 : i32
    %c0_i32_0 = arith.constant 0 : i32
    %c0_i32_1 = arith.constant 0 : i32
    return %c0_i32, %c0_i32_0 : i32, i32
  }
  func.func @transform_12(%arg0: i32) -> (i32, i32) {
    %c0_i32 = arith.constant 0 : i32
    %c0_i32_0 = arith.constant 0 : i32
    %c0_i32_1 = arith.constant 0 : i32
    return %c0_i32, %c0_i32_0 : i32, i32
  }
  func.func @transform_13(%arg0: i32) -> (i32, i32) {
    %c0_i32 = arith.constant 0 : i32
    %c0_i32_0 = arith.constant 0 : i32
    %c0_i32_1 = arith.constant 0 : i32
    return %c0_i32, %c0_i32_0 : i32, i32
  }
  func.func @transform_14(%arg0: i32) -> (i32, i32) {
    %c0_i32 = arith.constant 0 : i32
    %c0_i32_0 = arith.constant 0 : i32
    %c0_i32_1 = arith.constant 0 : i32
    return %c0_i32, %c0_i32_0 : i32, i32
  }
  func.func @transform_15(%arg0: i32) -> (i32, i32) {
    %c0_i32 = arith.constant 0 : i32
    %c0_i32_0 = arith.constant 0 : i32
    %c0_i32_1 = arith.constant 0 : i32
    return %c0_i32, %c0_i32_0 : i32, i32
  }
  func.func @transform_16(%arg0: i32) -> (i32, i32) {
    %c0_i32 = arith.constant 0 : i32
    %c0_i32_0 = arith.constant 0 : i32
    %c0_i32_1 = arith.constant 0 : i32
    return %c0_i32, %c0_i32_0 : i32, i32
  }
  func.func @transform_17(%arg0: i32) -> (i32, i32) {
    %c0_i32 = arith.constant 0 : i32
    %c0_i32_0 = arith.constant 0 : i32
    %c0_i32_1 = arith.constant 0 : i32
    return %c0_i32, %c0_i32_0 : i32, i32
  }
  func.func @transform_18(%arg0: i32) -> (i32, i32) {
    %c0_i32 = arith.constant 0 : i32
    %c0_i32_0 = arith.constant 0 : i32
    %c0_i32_1 = arith.constant 0 : i32
    return %c0_i32, %c0_i32_0 : i32, i32
  }
  func.func @transform_19(%arg0: i32) -> (i32, i32) {
    %c0_i32 = arith.constant 0 : i32
    %c0_i32_0 = arith.constant 0 : i32
    %c0_i32_1 = arith.constant 0 : i32
    return %c0_i32, %c0_i32_0 : i32, i32
  }
  func.func @transform_20(%arg0: i32) -> (i32, i32) {
    %c0_i32 = arith.constant 0 : i32
    %c0_i32_0 = arith.constant 0 : i32
    %c0_i32_1 = arith.constant 0 : i32
    return %c0_i32, %c0_i32_0 : i32, i32
  }
  func.func @transform_21(%arg0: i32) -> (i32, i32) {
    %c0_i32 = arith.constant 0 : i32
    %c0_i32_0 = arith.constant 0 : i32
    %c0_i32_1 = arith.constant 0 : i32
    return %c0_i32, %c0_i32_0 : i32, i32
  }
  func.func @transform_22(%arg0: i32) -> (i32, i32) {
    %c0_i32 = arith.constant 0 : i32
    %c0_i32_0 = arith.constant 0 : i32
    %c0_i32_1 = arith.constant 0 : i32
    return %c0_i32, %c0_i32_0 : i32, i32
  }
  func.func @transform_23(%arg0: i32) -> (i32, i32) {
    %c0_i32 = arith.constant 0 : i32
    %c0_i32_0 = arith.constant 0 : i32
    %c0_i32_1 = arith.constant 0 : i32
    return %c0_i32, %c0_i32_0 : i32, i32
  }
  func.func @transform_24(%arg0: i32) -> (i32, i32) {
    %c0_i32 = arith.constant 0 : i32
    %c0_i32_0 = arith.constant 0 : i32
    %c0_i32_1 = arith.constant 0 : i32
    return %c0_i32, %c0_i32_0 : i32, i32
  }
  func.func @transform_25(%arg0: i32) -> (i32, i32) {
    %c0_i32 = arith.constant 0 : i32
    %c0_i32_0 = arith.constant 0 : i32
    %c0_i32_1 = arith.constant 0 : i32
    return %c0_i32, %c0_i32_0 : i32, i32
  }
  func.func @transform_26(%arg0: i32) -> (i32, i32) {
    %c0_i32 = arith.constant 0 : i32
    %c0_i32_0 = arith.constant 0 : i32
    %c0_i32_1 = arith.constant 0 : i32
    return %c0_i32, %c0_i32_0 : i32, i32
  }
  func.func @transform_27(%arg0: i32) -> (i32, i32) {
    %c0_i32 = arith.constant 0 : i32
    %c0_i32_0 = arith.constant 0 : i32
    %c0_i32_1 = arith.constant 0 : i32
    return %c0_i32, %c0_i32_0 : i32, i32
  }
  func.func @transform_28(%arg0: i32) -> (i32, i32, i32) {
    %c0_i32 = arith.constant 0 : i32
    %c0_i32_0 = arith.constant 0 : i32
    %c0_i32_1 = arith.constant 0 : i32
    return %arg0, %c0_i32, %c0_i32_0 : i32, i32, i32
  }
}

</mosaic_0001>

<bundles_post_ra>
// kernel: tpu_custom_call.1
= control target key start
LH: loop header
LB: loop body
LE: loop exit
PB: predicated region body
PF: predicated region fallthrough
CT: control target
= control target key end

     0   :  { %s2790_s0 = inlined_call_operand.vmem [shape: f32[4,16,8], index: 0, kind: input, shape index: {}]   ;;  %s2791_s1 = inlined_call_operand.vmem [shape: f32[4,16,16], index: 1, kind: input, shape index: {}]   ;;  %s2792_s2 = inlined_call_operand.vmem [shape: f32[8,32], index: 2, kind: input, shape index: {}]   ;;  %s2793_s3 = inlined_call_operand.vmem [shape: f32[1,32], index: 3, kind: input, shape index: {}]   ;;  %s2794_s4 = inlined_call_operand.vmem [shape: f32[32,32], index: 4, kind: input, shape index: {}]   ;;  %s2795_s5 = inlined_call_operand.vmem [shape: f32[4,32], index: 5, kind: input, shape index: {}]   ;;  %s2796_s6 = inlined_call_operand.vmem [shape: f32[32,4], index: 6, kind: input, shape index: {}]   ;;  %s2797_s7 = inlined_call_operand.vmem [shape: f32[4,32], index: 7, kind: input, shape index: {}]   ;;  %s2798_s8 = inlined_call_operand.vmem [shape: f32[1,32], index: 8, kind: input, shape index: {}]   ;;  %s2799_s9 = inlined_call_operand.vmem [shape: f32[1,32], index: 9, kind: input, shape index: {}]   ;;  %s2800_s10 = inlined_call_operand.vmem [shape: f32[32,32], index: 10, kind: input, shape index: {}]   ;;  %s2801_s11 = inlined_call_operand.vmem [shape: f32[4,32], index: 11, kind: input, shape index: {}]   ;;  %s2802_s12 = inlined_call_operand.vmem [shape: f32[32,4], index: 12, kind: input, shape index: {}]   ;;  %s2803_s13 = inlined_call_operand.vmem [shape: f32[4,32], index: 13, kind: input, shape index: {}]   ;;  %s2804_s14 = inlined_call_operand.vmem [shape: f32[1,32], index: 14, kind: input, shape index: {}]   ;;  %s2805_s15 = inlined_call_operand.vmem [shape: f32[1,32], index: 15, kind: input, shape index: {}]   ;;  %s2806_s16 = inlined_call_operand.vmem [shape: f32[32,32], index: 16, kind: input, shape index: {}]   ;;  %s2807_s17 = inlined_call_operand.vmem [shape: f32[1,32], index: 17, kind: input, shape index: {}]   ;;  %s2808_s18 = inlined_call_operand.vmem [shape: f32[32,1], index: 18, kind: input, shape index: {}]   ;;  %s2809_s19 = inlined_call_operand.vmem [shape: f32[1,32], index: 19, kind: input, shape index: {}]   ;;  %s2810_s20 = inlined_call_operand.vmem [shape: f32[1,32], index: 20, kind: input, shape index: {}]   ;;  %s2811_s21 = inlined_call_operand.vmem [shape: f32[1,32], index: 21, kind: input, shape index: {}]   ;;  %s2812_s22 = inlined_call_operand.vmem [shape: f32[32,16], index: 22, kind: input, shape index: {}]   ;;  %s2813_s23 = inlined_call_operand.vmem [shape: f32[1,16], index: 23, kind: input, shape index: {}]   ;;  %s2814_s24 = inlined_call_operand.vmem [shape: f32[16,8], index: 24, kind: input, shape index: {}]   ;;  %s2815_s25 = inlined_call_operand.vmem [shape: f32[1,8], index: 25, kind: input, shape index: {}]   ;;  %s2816_s26 = inlined_call_operand.vmem [shape: f32[8,1], index: 26, kind: input, shape index: {}]   ;;  %s2817_s27 = inlined_call_operand.<no memory space> [shape: f32[1,1], index: 27, kind: input, shape index: {}]   ;;  %s2818_s28 = inlined_call_operand.vmem [shape: f32[4,1,1], index: 28, kind: output, shape index: {}]  }
   0x1   :  { %2826 = sst [smem:[#allocation3_spill]] %s2790_s0  ;;  %v33_v0 = vstv %s2817_s27 }
   0x2   :  { %2827 = sst [smem:[#allocation4_spill]] %s2791_s1  ;;  %34 = vst [vmem:[#allocation2] sm:$0x1] %v33_v0 }
   0x3   :  { %2828 = sst [smem:[#allocation5_spill]] %s2792_s2 }
   0x4   :  { %2829 = sst [smem:[#allocation6_spill]] %s2793_s3 }
   0x5   :  { %2830 = sst [smem:[#allocation7_spill]] %s2794_s4 }
   0x6   :  { %2831 = sst [smem:[#allocation8_spill]] %s2795_s5  ;;  %s2450_s5 = smov 0  }
   0x7   :  { %2832 = sst [smem:[#allocation9_spill]] %s2796_s6 }
   0x8   :  { %2833 = sst [smem:[#allocation10_spill]] %s2797_s7 }
   0x9   :  { %2834 = sst [smem:[#allocation11_spill]] %s2798_s8 }
   0xa   :  { %2835 = sst [smem:[#allocation12_spill]] %s2799_s9 }
   0xb   :  { %2836 = sst [smem:[#allocation13_spill]] %s2800_s10 }
   0xc   :  { %2837 = sst [smem:[#allocation14_spill]] %s2801_s11 }
   0xd   :  { %2838 = sst [smem:[#allocation15_spill]] %s2802_s12 }
   0xe LB: > { %s2092_s9 = sadd.s32 4294967295, %s2294_s5   ;;  %p2096_p0 = scmp.ge.s32.totalorder %s2294_s5, 1  ;;  %s2294_s5 = sphi %s2450_s5, %s40_s5  }
   0xf   : > { %p774_p1 = scmp.lt.s32.totalorder %s2294_s5, 5 }
  0x11   : > { %p775_p2 = pnand %p2096_p0, %p774_p1 }
  0x12   : > { %s2839_s6 = sld [smem:[#allocation5_spill]] (!%p775_p2)  ;;  %p851_p3 = scmp.lt.s32.totalorder (!%p775_p2), %s2092_s9, 3 }
  0x13   : > { %778 = sbr.rel (%p775_p2) target bundleno = 2966 (0xb96), region = 132  ;;  %s2840_s0 = sld [smem:[#allocation7_spill]] (!%p775_p2) }
  0x14   : > { %s2841_s7 = sld [smem:[#allocation3_spill]] (!%p775_p2) }
  0x15   : > { %s2842_s10 = sld [smem:[#allocation9_spill]] (!%p775_p2) }
  0x16   : > { %s2843_s4 = sld [smem:[#allocation6_spill]] (!%p775_p2) }
  0x17   : > { %s2844_s27 = sld [smem:[#allocation10_spill]] (!%p775_p2) }
  0x18   : > { %v872_v1 = vld [vmem:[%s2839_s6] sm:$0xff]  ;;  %s2853_s9 = smov (!%p851_p3, %s2092_s9), 3  ;;  %vm877_vm0 = vcmask 64512   ;;  %vm911_vm1 = vcmask 261120   ;;  %v2296_v17 = vmov 2   ;;  %v2297_v18 = vmov 1  }
  0x19   : > { %v910_v2 = vld [vmem:[%s2840_s0 + $0x18] sm:$0xff]  ;;  %899 = vmatpush.msra.mxu0 %v872_v1  ;;  %v909_v3 = vld [vmem:[%s2840_s0 + $0x10] sm:$0xff]  ;;  %s2153_s19 = sshll.u32 %s2853_s9, 4  ;;  %v908_v6 = vld [vmem:[%s2840_s0 + $0x8] sm:$0xff]  ;;  %2172 = vset.pattern.permute.xlu2 %v2296_v17  ;;  %v2298_v19 = vmov 0   ;;  %s2845_s30 = sld [smem:[#allocation8_spill]] }
  0x1a   : > { %930 = vmatpush.msra.mxu1 %v910_v2  ;;  %s855_s1 = scalar_lea.vmem %s2841_s7, %s2153_s19  ;;  %v907_v7 = vld [vmem:[%s2840_s0] sm:$0xff]  ;;  %2169 = vset.pattern.permute.xlu0 %v2297_v18  ;;  %v2299_v37 = vmov 3   ;;  %s2846_s11 = sld [smem:[#allocation4_spill]]  ;;  %v2300_v52 = vmov -1e+30   ;;  %vm1019_vm6 = vcmask 130048  }
  0x1b   : > { %v864_v4 = vld [vmem:[%s855_s1] sm:$0xff]  ;;  %v865_v5 = vld [vmem:[%s855_s1 + $0x8] sm:$0xff]  ;;  %v944_v8 = vld [vmem:[%s2842_s10 + $0x18] sm:$0xff]  ;;  %2171 = vset.pattern.permute.xlu1 %v2298_v19  ;;  %s2847_s12 = sld [smem:[#allocation13_spill]] }
  0x1c   : > { %931 = vmatpush.msra.mxu1 %v909_v3  ;;  %2101 = vmatmul.msk.f32.vlgmr.msra.gmra.mxu0 %vm877_vm0, %v864_v4  ;;  %v943_v9 = vld [vmem:[%s2842_s10 + $0x10] sm:$0xff]  ;;  %v942_v10 = vld [vmem:[%s2842_s10 + $0x8] sm:$0xff]  ;;  %v2187_v11 = vld [vmem:[%s2843_s4] ss:$0 sm:$0xff]  ;;  %s2849_s7 = sld [smem:[#allocation15_spill]] }
  0x1d   : > { %963 = vmatpush.msra.mxu2 %v944_v8  ;;  %v941_v16 = vld [vmem:[%s2842_s10] sm:$0xff]  ;;  %s2850_s3 = sld [smem:[#allocation12_spill]] }
  0x1e   : > { %932 = vmatpush.msra.mxu1 %v908_v6  ;;  %v2188_v21 = vld [vmem:[%s2844_s27] ss:$0 sm:$0xff]  ;;  %v2189_v22 = vld [vmem:[%s2844_s27 + $0x2] ss:$0 sm:$0xff]  ;;  %v2190_v23 = vld [vmem:[%s2844_s27 + $0x3] ss:$0 sm:$0xff] }
  0x1f   : > { %964 = vmatpush.msra.mxu2 %v943_v9  ;;  %v2191_v28 = vld [vmem:[%s2844_s27 + $0x1] ss:$0 sm:$0xff]  ;;  %s2851_s6 = sld [smem:[#allocation14_spill]] }
  0x20   : > { %933 = vmatpush.msra.mxu1 %v907_v7  ;;  %v974_v33 = vld [vmem:[%s2845_s30] sm:$0xf]  ;;  %s860_s29 = scalar_lea.vmem %s2846_s11, %s2153_s19 }
  0x21   : > { %965 = vmatpush.msra.mxu2 %v942_v10  ;;  %v866_v44 = vld [vmem:[%s860_s29] sm:$0xff]  ;;  %v867_v61 = vld [vmem:[%s860_s29 + $0x8] sm:$0xff]  ;;  %s2848_s29 = sld [smem:[#allocation11_spill]] }
  0x22   : > { %vm868_vm2 = vcmp.gt.f32.partialorder %v866_v44, 0.0  ;;  %vm869_vm7 = vcmp.gt.f32.partialorder %v867_v61, 0.0 }
  0x23   : > { %966 = vmatpush.msra.mxu2 %v941_v16  ;;  %v2547_v53 = vsel %vm868_vm2, 0.0, %v2300_v52  ;;  %v2555_v10 = vsel %vm869_vm7, 0.0, %v2300_v52 }
  0x24   : > { %2102 = vmatmul.msk.f32.gmra.mxu0 %vm877_vm0, %v865_v5 }
  0x99   : > { %v901_v12 = vpop.f32.mrf.mxu0 }
  0x9a   : > { %v2495_v13 = vadd.f32 %v2187_v11, %v901_v12 }
  0x9c   : > { %2103 = vmatmul.msk.f32.vlgmr.msra.gmra.mxu1 %vm911_vm1, %v2495_v13 }
  0xa1   : > { %v904_v14 = vpop.f32.mrf.mxu0 }
  0xa2   : > { %v2499_v15 = vadd.f32 %v2187_v11, %v904_v14 }
  0xa4   : > { %2104 = vmatmul.msk.f32.gmra.mxu1 %vm911_vm1, %v2499_v15 }
 0x119   : > { %v935_v20 = vpop.f32.mrf.mxu1 }
 0x11a   : > { %2105 = vmatmul.msk.f32.vlgmr.msra.gmra.mxu2 %vm911_vm1, %v935_v20  ;;  %v1044_v29 = vmul.f32 %v2188_v21, %v935_v20  ;;  %v1192_v31 = vmul.f32 %v2189_v22, %v935_v20  ;;  %v1268_v32 = vmul.f32 %v2190_v23, %v935_v20  ;;  %v1089_v34 = vmul.f32 %v2191_v28, %v935_v20 }
 0x121   : > { %v938_v24 = vpop.f32.mrf.mxu1 }
 0x122   : > { %2107 = vmatpush.xpose.msk.msra.mxu3 %vm911_vm1, %v938_v24  ;;  %2106 = vmatmul.msk.f32.gmra.mxu2 %vm911_vm1, %v938_v24  ;;  %v1045_v25 = vmul.f32 %v2188_v21, %v938_v24  ;;  %v1193_v26 = vmul.f32 %v2189_v22, %v938_v24  ;;  %v1269_v27 = vmul.f32 %v2190_v23, %v938_v24 }
 0x123   : > { %v1090_v30 = vmul.f32 %v2191_v28, %v938_v24 }
 0x124   : > { %1140 = vmatpush.msrb.mxu0 %v1045_v25  ;;  %1214 = vmatpush.msrb.mxu1 %v1193_v26 }
 0x125   : > { %1290 = vmatpush.msrb.mxu2 %v1269_v27 }
 0x126   : > { %2108 = vmatpush.xpose.msk.msra.mxu3 %vm911_vm1, %v935_v20  ;;  %1141 = vmatpush.msrb.mxu0 %v1044_v29 }
 0x127   : > { %1215 = vmatpush.msrb.mxu1 %v1192_v31  ;;  %1291 = vmatpush.msrb.mxu2 %v1268_v32 }
 0x129   : > { %2109 = vmatmul.msk.f32.vlgmr.msra.gmra.mxu3 %vm911_vm1, %v974_v33 }
 0x12a   : > { %1111 = vmatpush.msrb.mxu3 %v1090_v30 }
 0x12c   : > { %1112 = vmatpush.msrb.mxu3 %v1089_v34 }
 0x19d   : > { %v968_v35 = vpop.f32.mrf.mxu2 }
 0x19e   : > { %1150 = vperm.xlu2 %2172, %v968_v35   ;;  %1000 = vperm.xlu1 %2171, %v968_v35  }
 0x19f   : > { %1047 = vperm.xlu0 %2169, %v968_v35  }
 0x1a5   : > { %v971_v36 = vpop.f32.mrf.mxu2 }
 0x1a6   : > { %2174 = vset.pattern.permute.xlu2 %v2299_v37  ;;  %2173 = vset.pattern.permute.xlu1 %v2297_v18 }
 0x1a7   : > { %2170 = vset.pattern.permute.xlu0 %v2299_v37  ;;  %1230 = vperm.xlu2 %2174, %v971_v36  }
 0x1a8   : > { %1226 = vperm.xlu0 %2170, %v968_v35   ;;  %1051 = vperm.xlu1 %2173, %v971_v36  }
 0x1ac   : > { %v2537_v39 = vpop.f32.mrf.mxu3 }
 0x1ad   : > { %v1157_v40 = vperm.slane %v2537_v39, 2  ;;  %v1008_v42 = vperm.slane %v2537_v39, 0  ;;  %v1054_v43 = vperm.slane %v2537_v39, 1  ;;  %v1233_v58 = vperm.slane %v2537_v39, 3 }
 0x1af   : > { %2176 = vset.pattern.permute.xlu2 %v2296_v17 }
 0x1b0   : > { %2175 = vset.pattern.permute.xlu1 %v2298_v19  ;;  %1154 = vperm.xlu2 %2176, %v971_v36  }
 0x1b1   : > { %1005 = vperm.xlu1 %2175, %v971_v36   ;;  %2177 = vset.pattern.permute.xlu0 %v2297_v18 }
 0x1b8   : > { %2179 = vset.pattern.permute.xlu2 %v2298_v19 }
 0x1b9   : > { %2178 = vset.pattern.permute.xlu1 %v2296_v17 }
 0x1f8   : > { %v1151_v38 = vpop.permute.xlu2 %1150 }
 0x1f9   : > { %v1158_v46 = vadd.f32 %v1157_v40, %v1151_v38 }
 0x1fb   : > { %v1162_v54 = vmul.f32 0.01, %v1158_v46  ;;  %vm1160_vm5 = vcmp.gt.f32.partialorder %v1158_v46, 0.0 }
 0x1fd   : > { %v1164_v0 = vsel %vm1160_vm5, %v1158_v46, %v1162_v54 }
 0x1fe   : > { %v1166_v7 = vadd.f32 %v1164_v0, %v2547_v53 }
 0x200   : > { %v1168_v22 = vsel %vm1019_vm6, %v1166_v7, -inf }
 0x201   : > { %v1231_v41 = vpop.permute.xlu2 %1230 }
 0x202   : > { %v1235_v4 = vadd.f32 %v1233_v58, %v1231_v41 }
 0x204   : > { %v1239_v12 = vmul.f32 0.01, %v1235_v4  ;;  %vm1237_vm11 = vcmp.gt.f32.partialorder %v1235_v4, 0.0 }
 0x206   : > { %v1241_v27 = vsel %vm1237_vm11, %v1235_v4, %v1239_v12 }
 0x207   : > { %v1243_v31 = vadd.f32 %v1241_v27, %v2555_v10 }
 0x209   : > { %v1247_v35 = vsel %vm1019_vm6, %v1243_v31, -inf }
 0x20a   : > { %v1155_v59 = vpop.permute.xlu2 %1154 }
 0x20b   : > { %v1159_v1 = vadd.f32 %v1157_v40, %v1155_v59 }
 0x20d   : > { %v1163_v11 = vmul.f32 0.01, %v1159_v1  ;;  %vm1161_vm10 = vcmp.gt.f32.partialorder %v1159_v1, 0.0 }
 0x20f   : > { %v1165_v25 = vsel %vm1161_vm10, %v1159_v1, %v1163_v11 }
 0x210   : > { %v1001_v45 = vpop.permute.xlu1 %1000  ;;  %v1167_v29 = vadd.f32 %v1165_v25, %v2555_v10 }
 0x211   : > { %v1009_v47 = vadd.f32 %v1008_v42, %v1001_v45  ;;  %v1048_v48 = vpop.permute.xlu0 %1047 }
 0x212   : > { %v1055_v49 = vadd.f32 %v1054_v43, %v1048_v48  ;;  %v1171_v33 = vsel %vm1019_vm6, %v1167_v29, -inf }
 0x213   : > { %vm1011_vm3 = vcmp.gt.f32.partialorder %v1009_v47, 0.0  ;;  %v1013_v50 = vmul.f32 0.01, %v1009_v47 }
 0x214   : > { %vm1057_vm4 = vcmp.gt.f32.partialorder %v1055_v49, 0.0  ;;  %v1059_v51 = vmul.f32 0.01, %v1055_v49 }
 0x215   : > { %v1015_v55 = vsel %vm1011_vm3, %v1009_v47, %v1013_v50 }
 0x216   : > { %v1061_v56 = vsel %vm1057_vm4, %v1055_v49, %v1059_v51  ;;  %v1017_v57 = vadd.f32 %v1015_v55, %v2547_v53 }
 0x217   : > { %v1063_v60 = vadd.f32 %v1061_v56, %v2547_v53 }
 0x218   : > { %v1020_v62 = vsel %vm1019_vm6, %v1017_v57, -inf }
 0x219   : > { %v1065_v63 = vsel %vm1019_vm6, %v1063_v60, -inf  ;;  %1021 = vmax.xlane.f32.xlu2 %v1020_v62 }
 0x21a   : > { %v1227_v2 = vpop.permute.xlu0 %1226  ;;  %1066 = vmax.xlane.f32.xlu0 %v1065_v63  ;;  %v1052_v3 = vpop.permute.xlu1 %1051 }
 0x21b   : > { %v1234_v5 = vadd.f32 %v1233_v58, %v1227_v2  ;;  %v1056_v6 = vadd.f32 %v1054_v43, %v1052_v3 }
 0x21d   : > { %vm1236_vm8 = vcmp.gt.f32.partialorder %v1234_v5, 0.0  ;;  %v1238_v8 = vmul.f32 0.01, %v1234_v5  ;;  %vm1058_vm9 = vcmp.gt.f32.partialorder %v1056_v6, 0.0  ;;  %v1060_v9 = vmul.f32 0.01, %v1056_v6 }
 0x21f   : > { %v1240_v14 = vsel %vm1236_vm8, %v1234_v5, %v1238_v8  ;;  %v1062_v16 = vsel %vm1058_vm9, %v1056_v6, %v1060_v9 }
 0x220   : > { %v1242_v20 = vadd.f32 %v1240_v14, %v2547_v53  ;;  %v1064_v21 = vadd.f32 %v1062_v16, %v2555_v10 }
 0x222   : > { %1169 = vmax.xlane.f32.xlu0 %v1168_v22  ;;  %v1244_v23 = vsel %vm1019_vm6, %v1242_v20, -inf  ;;  %v1068_v24 = vsel %vm1019_vm6, %v1064_v21, -inf }
 0x223   : > { %1245 = vmax.xlane.f32.xlu1 %v1244_v23  ;;  %1069 = vmax.xlane.f32.xlu2 %v1068_v24  ;;  %v1006_v26 = vpop.permute.xlu1 %1005 }
 0x224   : > { %v1010_v28 = vadd.f32 %v1008_v42, %v1006_v26 }
 0x226   : > { %vm1012_vm12 = vcmp.gt.f32.partialorder %v1010_v28, 0.0  ;;  %v1014_v30 = vmul.f32 0.01, %v1010_v28 }
 0x228   : > { %v1016_v32 = vsel %vm1012_vm12, %v1010_v28, %v1014_v30 }
 0x229   : > { %v1018_v34 = vadd.f32 %v1016_v32, %v2555_v10 }
 0x22a   : > { %1172 = vmax.xlane.f32.xlu0 %v1171_v33 }
 0x22b   : > { %1248 = vmax.xlane.f32.xlu1 %v1247_v35  ;;  %v1023_v36 = vsel %vm1019_vm6, %v1018_v34, -inf }
 0x22c   : > { %1024 = vmax.xlane.f32.xlu2 %v1023_v36 }
 0x28c   : > { %v1022_v38 = vpop.xlane.xlu2 %1021 }
 0x28d   : > { %v1067_v39 = vpop.xlane.xlu0 %1066  ;;  %v1026_v40 = vsub.f32 %v1017_v57, %v1022_v38 }
 0x28e   : > { %v1071_v41 = vsub.f32 %v1063_v60, %v1067_v39 }
 0x28f   : > { %v1028_v42 = vmul.f32 1.442695, %v1026_v40 }
 0x290   : > { %v1073_v43 = vmul.f32 1.442695, %v1071_v41 }
 0x291   : > { %2202 = vpow2.f32 %v1028_v42 }
 0x292   : > { %2204 = vpow2.f32 %v1073_v43 }
 0x295   : > { %v1170_v44 = vpop.xlane.xlu0 %1169 }
 0x296   : > { %v1070_v45 = vpop.xlane.xlu2 %1069  ;;  %v1246_v46 = vpop.xlane.xlu1 %1245  ;;  %v1174_v56 = vsub.f32 %v1166_v7, %v1170_v44 }
 0x297   : > { %v2203_v47 = vpop.eup %2202  ;;  %v1072_v48 = vsub.f32 %v1064_v21, %v1070_v45  ;;  %v1250_v49 = vsub.f32 %v1242_v20, %v1246_v46  ;;  %v1330_v46 = vld [vmem:[%s2847_s12 + $0x18] sm:$0xff] }
 0x298   : > { %v2205_v50 = vpop.eup %2204  ;;  %v1032_v51 = vsel %vm1019_vm6, %v2203_v47, 0.0  ;;  %v1176_v57 = vmul.f32 1.442695, %v1174_v56  ;;  %1349 = vmatpush.msra.mxu3 %v1330_v46 }
 0x299   : > { %v1075_v52 = vmul.f32 1.442695, %v1072_v48  ;;  %v1252_v54 = vmul.f32 1.442695, %v1250_v49  ;;  %1033 = vadd.xlane.f32.xlu0 %v1032_v51  ;;  %v1077_v55 = vsel %vm1019_vm6, %v2205_v50, 0.0  ;;  %v1328_v48 = vld [vmem:[%s2847_s12 + $0x8] sm:$0xff] }
 0x29a   : > { %1078 = vadd.xlane.f32.xlu1 %v1077_v55  ;;  %v1327_v49 = vld [vmem:[%s2847_s12] sm:$0xff] }
 0x29b   : > { %2206 = vpow2.f32 %v1075_v52 }
 0x29c   : > { %2208 = vpow2.f32 %v1252_v54 }
 0x29d   : > { %v1173_v59 = vpop.xlane.xlu0 %1172  ;;  %2210 = vpow2.f32 %v1176_v57  ;;  %v2192_v57 = vld [vmem:[%s2848_s29] ss:$0 sm:$0xff] }
 0x29e   : > { %v1249_v58 = vpop.xlane.xlu1 %1248  ;;  %v1175_v2 = vsub.f32 %v1167_v29, %v1173_v59  ;;  %v1362_v59 = vld [vmem:[%s2849_s7 + $0x10] sm:$0xff] }
 0x29f   : > { %v1251_v60 = vsub.f32 %v1243_v31, %v1249_v58  ;;  %v1025_v61 = vpop.xlane.xlu2 %1024  ;;  %v1363_v58 = vld [vmem:[%s2849_s7 + $0x18] sm:$0xff] }
 0x2a0   : > { %v1027_v62 = vsub.f32 %v1018_v34, %v1025_v61  ;;  %v1178_v6 = vmul.f32 1.442695, %v1175_v2  ;;  %1382 = vmatpush.msra.mxu0 %v1363_v58  ;;  %v2193_v61 = vld [vmem:[%s2850_s3] ss:$0 sm:$0xff]  ;;  %s863_s3 = scalar_lea.vmem %s2818_s28, %s2853_s9 }
 0x2a1   : > { %v2207_v63 = vpop.eup %2206  ;;  %v1254_v0 = vmul.f32 1.442695, %v1251_v60 }
 0x2a2   : > { %v2209_v1 = vpop.eup %2208  ;;  %v1030_v3 = vmul.f32 1.442695, %v1027_v62  ;;  %v1080_v4 = vsel %vm1019_vm6, %v2207_v63, 0.0  ;;  %v1361_v62 = vld [vmem:[%s2849_s7 + $0x8] sm:$0xff]  ;;  %1383 = vmatpush.msra.mxu0 %v1362_v59 }
 0x2a3   : > { %2212 = vpow2.f32 %v1254_v0  ;;  %1081 = vadd.xlane.f32.xlu1 %v1080_v4  ;;  %v1256_v5 = vsel %vm1019_vm6, %v2209_v1, 0.0  ;;  %v2211_v7 = vpop.eup %2210 }
 0x2a4   : > { %2214 = vpow2.f32 %v1030_v3  ;;  %1257 = vadd.xlane.f32.xlu2 %v1256_v5  ;;  %v1180_v12 = vsel %vm1019_vm6, %v2211_v7, 0.0  ;;  %1384 = vmatpush.msra.mxu0 %v1361_v62 }
 0x2a5   : > { %2216 = vpow2.f32 %v1178_v6 }
 0x2a9   : > { %v2213_v8 = vpop.eup %2212 }
 0x2aa   : > { %v2215_v9 = vpop.eup %2214  ;;  %v1259_v11 = vsel %vm1019_vm6, %v2213_v8, 0.0 }
 0x2ab   : > { %1260 = vadd.xlane.f32.xlu0 %v1259_v11  ;;  %v1035_v14 = vsel %vm1019_vm6, %v2215_v9, 0.0  ;;  %v2217_v16 = vpop.eup %2216 }
 0x2ac   : > { %1181 = vadd.xlane.f32.xlu2 %v1180_v12  ;;  %1036 = vadd.xlane.f32.xlu1 %v1035_v14  ;;  %v1183_v20 = vsel %vm1019_vm6, %v2217_v16, 0.0 }
 0x2b4   : > { %1184 = vadd.xlane.f32.xlu2 %v1183_v20 }
 0x30c   : > { %v1034_v21 = vpop.xlane.xlu0 %1033 }
 0x30d   : > { %2218 = vrcp.f32 %v1034_v21  ;;  %v1079_v22 = vpop.xlane.xlu1 %1078 }
 0x30e   : > { %2220 = vrcp.f32 %v1079_v22 }
 0x313   : > { %v2219_v23 = vpop.eup %2218 }
 0x314   : > { %v2221_v24 = vpop.eup %2220  ;;  %v1040_v25 = vmul.f32 %v2219_v23, %v2203_v47  ;;  %v1329_v47 = vld [vmem:[%s2847_s12 + $0x10] sm:$0xff] }
 0x315   : > { %v1085_v26 = vmul.f32 %v2221_v24, %v2205_v50  ;;  %1350 = vmatpush.msra.mxu3 %v1329_v47 }
 0x316   : > { %v1082_v27 = vpop.xlane.xlu1 %1081  ;;  %2112 = vmatmul.msk.f32.vlgmr.msrb.gmra.mxu0 %vm1019_vm6, %v1040_v25 }
 0x317   : > { %v1258_v28 = vpop.xlane.xlu2 %1257  ;;  %2222 = vrcp.f32 %v1082_v27  ;;  %2110 = vmatmul.msk.f32.vlgmr.msrb.gmra.mxu3 %vm1019_vm6, %v1085_v26 }
 0x318   : > { %2224 = vrcp.f32 %v1258_v28  ;;  %1351 = vmatpush.msra.mxu3 %v1328_v48 }
 0x31a   : > { %1352 = vmatpush.msra.mxu3 %v1327_v49 }
 0x31d   : > { %v2223_v29 = vpop.eup %2222 }
 0x31e   : > { %v2225_v30 = vpop.eup %2224  ;;  %v1261_v31 = vpop.xlane.xlu0 %1260  ;;  %v1086_v32 = vmul.f32 %v2223_v29, %v2207_v63 }
 0x31f   : > { %v1182_v33 = vpop.xlane.xlu2 %1181  ;;  %2226 = vrcp.f32 %v1261_v31  ;;  %v1037_v34 = vpop.xlane.xlu1 %1036  ;;  %v1264_v35 = vmul.f32 %v2225_v30, %v2209_v1  ;;  %v1360_v1 = vld [vmem:[%s2849_s7] sm:$0xff] }
 0x320   : > { %2228 = vrcp.f32 %v1182_v33  ;;  %2111 = vmatmul.msk.f32.gmra.mxu3 %vm1019_vm6, %v1086_v32  ;;  %1385 = vmatpush.msra.mxu0 %v1360_v1  ;;  %v2195_v30 = vld [vmem:[%s2803_s13 + $0x2] ss:$0 sm:$0xff]  ;;  %v2196_v31 = vld [vmem:[%s2803_s13 + $0x3] ss:$0 sm:$0xff] }
 0x321   : > { %2230 = vrcp.f32 %v1037_v34  ;;  %2116 = vmatmul.msk.f32.vlgmr.msrb.gmra.mxu2 %vm1019_vm6, %v1264_v35 }
 0x325   : > { %v2227_v36 = vpop.eup %2226 }
 0x326   : > { %v2229_v38 = vpop.eup %2228  ;;  %v1265_v39 = vmul.f32 %v2227_v36, %v2213_v8  ;;  %v2197_v36 = vld [vmem:[%s2803_s13] ss:$0 sm:$0xff] }
 0x327   : > { %v2231_v40 = vpop.eup %2230  ;;  %v1185_v41 = vpop.xlane.xlu2 %1184  ;;  %v1188_v42 = vmul.f32 %v2229_v38, %v2211_v7 }
 0x328   : > { %2232 = vrcp.f32 %v1185_v41  ;;  %v1041_v43 = vmul.f32 %v2231_v40, %v2215_v9  ;;  %v1393_v41 = vld [vmem:[%s2851_s6] sm:$0xf] }
 0x329   : > { %2114 = vmatmul.msk.f32.vlgmr.msrb.gmra.mxu1 %vm1019_vm6, %v1188_v42  ;;  %2117 = vmatmul.msk.f32.gmra.mxu2 %vm1019_vm6, %v1265_v39 }
 0x32a   : > { %2113 = vmatmul.msk.f32.gmra.mxu0 %vm1019_vm6, %v1041_v43 }
 0x32e   : > { %v2233_v44 = vpop.eup %2232 }
 0x32f   : > { %v1189_v45 = vmul.f32 %v2233_v44, %v2217_v16 }
 0x331   : > { %2115 = vmatmul.msk.f32.gmra.mxu1 %vm1019_vm6, %v1189_v45 }
 0x393   : > { %v1143_v50 = vpop.f32.mrf.mxu0 }
 0x39a   : > { %v1114_v51 = vpop.f32.mrf.mxu3 }
 0x39b   : > { %v1144_v52 = vadd.f32 %v1143_v50, %v1114_v51 }
 0x3a3   : > { %v1117_v2 = vpop.f32.mrf.mxu3 }
 0x3a4   : > { %v1293_v54 = vpop.f32.mrf.mxu2 }
 0x3a6   : > { %v1217_v55 = vpop.f32.mrf.mxu1 }
 0x3a7   : > { %v1223_v56 = vadd.f32 %v1217_v55, %v1144_v52  ;;  %v1146_v63 = vpop.f32.mrf.mxu0 }
 0x3a8   : > { %v1147_v4 = vadd.f32 %v1146_v63, %v1117_v2 }
 0x3a9   : > { %v1299_v60 = vadd.f32 %v1293_v54, %v1223_v56 }
 0x3ab   : > { %v1305_v0 = vmul.f32 %v2192_v57, %v1299_v60 }
 0x3ac   : > { %v1296_v8 = vpop.f32.mrf.mxu2 }
 0x3ad   : > { %v1311_v3 = vadd.f32 %v2193_v61, %v1305_v0 }
 0x3ae   : > { %v1220_v5 = vpop.f32.mrf.mxu1 }
 0x3af   : > { %v1315_v6 = vmin.f32 %v1311_v3, 0.0  ;;  %v1224_v7 = vadd.f32 %v1220_v5, %v1147_v4  ;;  %vm1313_vm13 = vcmp.gt.f32.partialorder %v1311_v3, 0.0 }
 0x3b1   : > { %v1317_v9 = vmul.f32 1.442695, %v1315_v6  ;;  %v1300_v11 = vadd.f32 %v1296_v8, %v1224_v7 }
 0x3b3   : > { %2234 = vpow2.f32 %v1317_v9  ;;  %v1306_v12 = vmul.f32 %v2192_v57, %v1300_v11 }
 0x3b5   : > { %v1312_v14 = vadd.f32 %v2193_v61, %v1306_v12 }
 0x3b7   : > { %v1316_v16 = vmin.f32 %v1312_v14, 0.0  ;;  %vm1314_vm14 = vcmp.gt.f32.partialorder %v1312_v14, 0.0 }
 0x3b9   : > { %v2235_v20 = vpop.eup %2234  ;;  %v1319_v21 = vmul.f32 1.442695, %v1316_v16 }
 0x3ba   : > { %v2118_v22 = vadd.f32 -1.0, %v2235_v20 }
 0x3bb   : > { %2236 = vpow2.f32 %v1319_v21 }
 0x3bc   : > { %v1323_v23 = vsel %vm1313_vm13, %v1311_v3, %v2118_v22 }
 0x3bd   : > { %v2615_v24 = vadd.f32 %v1323_v23, %v2495_v13  ;;  %v2194_v13 = vld [vmem:[%s2803_s13 + $0x1] ss:$0 sm:$0xff] }
 0x3bf   : > { %2120 = vmatmul.msk.f32.vlgmr.msra.gmra.mxu3 %vm911_vm1, %v2615_v24 }
 0x3c1   : > { %v2237_v25 = vpop.eup %2236 }
 0x3c2   : > { %v2119_v26 = vadd.f32 -1.0, %v2237_v25 }
 0x3c4   : > { %v1324_v27 = vsel %vm1314_vm14, %v1312_v14, %v2119_v26 }
 0x3c5   : > { %v2620_v28 = vadd.f32 %v1324_v27, %v2499_v15 }
 0x3c7   : > { %2121 = vmatmul.msk.f32.gmra.mxu3 %vm911_vm1, %v2620_v28 }
 0x442   : > { %v1354_v29 = vpop.f32.mrf.mxu3 }
 0x443   : > { %2122 = vmatmul.msk.f32.vlgmr.msra.gmra.mxu0 %vm911_vm1, %v1354_v29  ;;  %v1507_v35 = vmul.f32 %v2194_v13, %v1354_v29  ;;  %v1610_v38 = vmul.f32 %v2195_v30, %v1354_v29  ;;  %v1686_v39 = vmul.f32 %v2196_v31, %v1354_v29  ;;  %v1462_v42 = vmul.f32 %v2197_v36, %v1354_v29 }
 0x44a   : > { %v1357_v15 = vpop.f32.mrf.mxu3 }
 0x44b   : > { %2123 = vmatmul.msk.f32.gmra.mxu0 %vm911_vm1, %v1357_v15  ;;  %2124 = vmatpush.xpose.msk.msra.mxu1 %vm911_vm1, %v1357_v15  ;;  %v1508_v32 = vmul.f32 %v2194_v13, %v1357_v15  ;;  %v1611_v33 = vmul.f32 %v2195_v30, %v1357_v15  ;;  %v1687_v34 = vmul.f32 %v2196_v31, %v1357_v15 }
 0x44c   : > { %v1463_v40 = vmul.f32 %v2197_v36, %v1357_v15 }
 0x44d   : > { %1529 = vmatpush.msra.mxu2 %v1508_v32  ;;  %1632 = vmatpush.msrb.mxu3 %v1611_v33 }
 0x44e   : > { %1708 = vmatpush.msrb.mxu0 %v1687_v34 }
 0x44f   : > { %2125 = vmatpush.xpose.msk.msra.mxu1 %vm911_vm1, %v1354_v29  ;;  %1530 = vmatpush.msra.mxu2 %v1507_v35 }
 0x450   : > { %1633 = vmatpush.msrb.mxu3 %v1610_v38  ;;  %1709 = vmatpush.msrb.mxu0 %v1686_v39 }
 0x452   : > { %2126 = vmatmul.msk.f32.vlgmr.msra.gmra.mxu1 %vm911_vm1, %v1393_v41 }
 0x453   : > { %1558 = vmatpush.msrb.mxu1 %v1463_v40 }
 0x455   : > { %1559 = vmatpush.msrb.mxu1 %v1462_v42 }
 0x4c0   : > { %v1387_v43 = vpop.f32.mrf.mxu0 }
 0x4c1   : > { %1419 = vperm.xlu2 %2179, %v1387_v43   ;;  %1568 = vperm.xlu1 %2178, %v1387_v43  }
 0x4c2   : > { %1465 = vperm.xlu0 %2177, %v1387_v43  }
 0x4c8   : > { %v1390_v44 = vpop.f32.mrf.mxu0 }
 0x4c9   : > { %2182 = vset.pattern.permute.xlu2 %v2296_v17  ;;  %2180 = vset.pattern.permute.xlu1 %v2297_v18 }
 0x4ca   : > { %2184 = vset.pattern.permute.xlu0 %v2299_v37  ;;  %1572 = vperm.xlu2 %2182, %v1390_v44  }
 0x4cb   : > { %1648 = vperm.xlu0 %2184, %v1390_v44   ;;  %1469 = vperm.xlu1 %2180, %v1390_v44  }
 0x4cf   : > { %v1414_v45 = vpop.f32.mrf.mxu1 }
 0x4d0   : > { %v1427_v46 = vperm.slane %v1414_v45, 0  ;;  %v1575_v51 = vperm.slane %v1414_v45, 2  ;;  %v1472_v52 = vperm.slane %v1414_v45, 1  ;;  %v1651_v4 = vperm.slane %v1414_v45, 3 }
 0x4d2   : > { %2183 = vset.pattern.permute.xlu2 %v2298_v19 }
 0x4d3   : > { %2181 = vset.pattern.permute.xlu1 %v2299_v37  ;;  %1424 = vperm.xlu2 %2183, %v1390_v44  }
 0x4d4   : > { %1644 = vperm.xlu1 %2181, %v1387_v43   ;;  %2185 = vset.pattern.permute.xlu0 %v2298_v19 }
 0x4dc   : > { %2186 = vset.pattern.permute.xlu1 %v2298_v19 }
 0x51b   : > { %v1420_v17 = vpop.permute.xlu2 %1419 }
 0x51c   : > { %v1428_v47 = vadd.f32 %v1427_v46, %v1420_v17 }
 0x51e   : > { %vm1430_vm15 = vcmp.gt.f32.partialorder %v1428_v47, 0.0  ;;  %v1432_v18 = vmul.f32 0.01, %v1428_v47 }
 0x520   : > { %v1434_v48 = vsel %vm1430_vm15, %v1428_v47, %v1432_v18 }
 0x521   : > { %v2652_v49 = vadd.f32 %v1434_v48, %v2547_v53 }
 0x523   : > { %v1438_v50 = vsel %vm1019_vm6, %v2652_v49, -inf }
 0x524   : > { %1439 = vmax.xlane.f32.xlu0 %v1438_v50  ;;  %v1573_v37 = vpop.permute.xlu2 %1572 }
 0x525   : > { %v1577_v55 = vadd.f32 %v1575_v51, %v1573_v37 }
 0x527   : > { %v1581_v60 = vmul.f32 0.01, %v1577_v55  ;;  %vm1579_vm4 = vcmp.gt.f32.partialorder %v1577_v55, 0.0 }
 0x529   : > { %v1583_v6 = vsel %vm1579_vm4, %v1577_v55, %v1581_v60 }
 0x52a   : > { %v1585_v14 = vadd.f32 %v1583_v6, %v2555_v10 }
 0x52c   : > { %v1589_v23 = vsel %vm1019_vm6, %v1585_v14, -inf }
 0x52d   : > { %v1425_v61 = vpop.permute.xlu2 %1424 }
 0x52e   : > { %v1429_v2 = vadd.f32 %v1427_v46, %v1425_v61 }
 0x530   : > { %v1433_v12 = vmul.f32 0.01, %v1429_v2  ;;  %vm1431_vm8 = vcmp.gt.f32.partialorder %v1429_v2, 0.0 }
 0x532   : > { %v1435_v27 = vsel %vm1431_vm8, %v1429_v2, %v1433_v12 }
 0x533   : > { %v1569_v54 = vpop.permute.xlu1 %1568  ;;  %v1437_v15 = vadd.f32 %v1435_v27, %v2555_v10 }
 0x534   : > { %v1576_v19 = vadd.f32 %v1575_v51, %v1569_v54  ;;  %v1466_v56 = vpop.permute.xlu0 %1465 }
 0x535   : > { %v1473_v57 = vadd.f32 %v1472_v52, %v1466_v56  ;;  %v1441_v33 = vsel %vm1019_vm6, %v1437_v15, -inf }
 0x536   : > { %vm1578_vm2 = vcmp.gt.f32.partialorder %v1576_v19, 0.0  ;;  %v1580_v58 = vmul.f32 0.01, %v1576_v19 }
 0x537   : > { %vm1475_vm3 = vcmp.gt.f32.partialorder %v1473_v57, 0.0  ;;  %v1477_v59 = vmul.f32 0.01, %v1473_v57 }
 0x538   : > { %v1582_v62 = vsel %vm1578_vm2, %v1576_v19, %v1580_v58 }
 0x539   : > { %v1584_v63 = vadd.f32 %v1582_v62, %v2547_v53  ;;  %v1479_v0 = vsel %vm1475_vm3, %v1473_v57, %v1477_v59 }
 0x53a   : > { %v1481_v1 = vadd.f32 %v1479_v0, %v2547_v53 }
 0x53b   : > { %v1586_v3 = vsel %vm1019_vm6, %v1584_v63, -inf }
 0x53c   : > { %1587 = vmax.xlane.f32.xlu2 %v1586_v3  ;;  %v1483_v5 = vsel %vm1019_vm6, %v1481_v1, -inf }
 0x53d   : > { %v1649_v7 = vpop.permute.xlu0 %1648  ;;  %1484 = vmax.xlane.f32.xlu1 %v1483_v5  ;;  %v1470_v8 = vpop.permute.xlu1 %1469 }
 0x53e   : > { %v1653_v9 = vadd.f32 %v1651_v4, %v1649_v7  ;;  %v1474_v11 = vadd.f32 %v1472_v52, %v1470_v8 }
 0x540   : > { %vm1655_vm5 = vcmp.gt.f32.partialorder %v1653_v9, 0.0  ;;  %v1657_v16 = vmul.f32 0.01, %v1653_v9  ;;  %vm1476_vm7 = vcmp.gt.f32.partialorder %v1474_v11, 0.0  ;;  %v1478_v20 = vmul.f32 0.01, %v1474_v11 }
 0x542   : > { %v1659_v21 = vsel %vm1655_vm5, %v1653_v9, %v1657_v16  ;;  %v1480_v22 = vsel %vm1476_vm7, %v1474_v11, %v1478_v20 }
 0x543   : > { %v1661_v25 = vadd.f32 %v1659_v21, %v2555_v10  ;;  %v1482_v26 = vadd.f32 %v1480_v22, %v2555_v10 }
 0x544   : > { %1590 = vmax.xlane.f32.xlu2 %v1589_v23 }
 0x545   : > { %v1665_v29 = vsel %vm1019_vm6, %v1661_v25, -inf  ;;  %v1486_v13 = vsel %vm1019_vm6, %v1482_v26, -inf }
 0x546   : > { %1666 = vmax.xlane.f32.xlu0 %v1665_v29  ;;  %1487 = vmax.xlane.f32.xlu1 %v1486_v13  ;;  %v1645_v30 = vpop.permute.xlu1 %1644 }
 0x547   : > { %v1652_v31 = vadd.f32 %v1651_v4, %v1645_v30 }
 0x549   : > { %vm1654_vm9 = vcmp.gt.f32.partialorder %v1652_v31, 0.0  ;;  %v1656_v32 = vmul.f32 0.01, %v1652_v31 }
 0x54b   : > { %v1658_v34 = vsel %vm1654_vm9, %v1652_v31, %v1656_v32 }
 0x54c   : > { %1442 = vmax.xlane.f32.xlu2 %v1441_v33  ;;  %v1660_v35 = vadd.f32 %v1658_v34, %v2547_v53 }
 0x54e   : > { %v1662_v36 = vsel %vm1019_vm6, %v1660_v35, -inf }
 0x54f   : > { %1663 = vmax.xlane.f32.xlu1 %v1662_v36 }
 0x597   : > { %v1440_v38 = vpop.xlane.xlu0 %1439 }
 0x598   : > { %v1444_v39 = vsub.f32 %v2652_v49, %v1440_v38 }
 0x59a   : > { %v1446_v40 = vmul.f32 1.442695, %v1444_v39 }
 0x59c   : > { %2238 = vpow2.f32 %v1446_v40 }
 0x5a2   : > { %v2239_v41 = vpop.eup %2238 }
 0x5a3   : > { %v1450_v42 = vsel %vm1019_vm6, %v2239_v41, 0.0 }
 0x5a4   : > { %1451 = vadd.xlane.f32.xlu0 %v1450_v42  ;;  %v1748_v42 = vld [vmem:[%s2806_s16 + $0x18] sm:$0xff] }
 0x5a5   : > { %1767 = vmatpush.msrb.mxu2 %v1748_v42 }
 0x5af   : > { %v1588_v43 = vpop.xlane.xlu2 %1587 }
 0x5b0   : > { %v1592_v44 = vsub.f32 %v1584_v63, %v1588_v43  ;;  %v1485_v45 = vpop.xlane.xlu1 %1484  ;;  %v1747_v43 = vld [vmem:[%s2806_s16 + $0x10] sm:$0xff] }
 0x5b1   : > { %v1489_v46 = vsub.f32 %v1481_v1, %v1485_v45  ;;  %1768 = vmatpush.msrb.mxu2 %v1747_v43  ;;  %v1745_v45 = vld [vmem:[%s2806_s16] sm:$0xff] }
 0x5b2   : > { %v1594_v17 = vmul.f32 1.442695, %v1592_v44  ;;  %v1746_v44 = vld [vmem:[%s2806_s16 + $0x8] sm:$0xff] }
 0x5b3   : > { %v1491_v47 = vmul.f32 1.442695, %v1489_v46  ;;  %1769 = vmatpush.msrb.mxu2 %v1746_v44 }
 0x5b4   : > { %2240 = vpow2.f32 %v1594_v17 }
 0x5b5   : > { %2242 = vpow2.f32 %v1491_v47  ;;  %1770 = vmatpush.msrb.mxu2 %v1745_v45 }
 0x5b7   : > { %v1591_v18 = vpop.xlane.xlu2 %1590 }
 0x5b8   : > { %v1593_v48 = vsub.f32 %v1585_v14, %v1591_v18 }
 0x5b9   : > { %v1667_v50 = vpop.xlane.xlu0 %1666  ;;  %v1488_v37 = vpop.xlane.xlu1 %1487 }
 0x5ba   : > { %v2241_v51 = vpop.eup %2240  ;;  %v1596_v49 = vmul.f32 1.442695, %v1593_v48  ;;  %v1669_v52 = vsub.f32 %v1661_v25, %v1667_v50  ;;  %v1490_v54 = vsub.f32 %v1482_v26, %v1488_v37  ;;  %v2198_v50 = vld [vmem:[%s2804_s14] ss:$0 sm:$0xff]  ;;  %v1781_v37 = vld [vmem:[%s2808_s18 + $0x18] sm:$0xff] }
 0x5bb   : > { %v2243_v55 = vpop.eup %2242  ;;  %v1598_v19 = vsel %vm1019_vm6, %v2241_v51, 0.0  ;;  %1800 = vmatpush.msra.mxu1 %v1781_v37 }
 0x5bc   : > { %2244 = vpow2.f32 %v1596_v49  ;;  %v1493_v56 = vmul.f32 1.442695, %v1490_v54  ;;  %1599 = vadd.xlane.f32.xlu2 %v1598_v19  ;;  %v1495_v57 = vsel %vm1019_vm6, %v2243_v55, 0.0  ;;  %v1672_v58 = vmul.f32 1.442695, %v1669_v52  ;;  %v1779_v19 = vld [vmem:[%s2808_s18 + $0x8] sm:$0xff] }
 0x5bd   : > { %1496 = vadd.xlane.f32.xlu1 %v1495_v57 }
 0x5be   : > { %2246 = vpow2.f32 %v1493_v56 }
 0x5bf   : > { %v1443_v59 = vpop.xlane.xlu2 %1442  ;;  %2248 = vpow2.f32 %v1672_v58 }
 0x5c0   : > { %v1445_v60 = vsub.f32 %v1437_v15, %v1443_v59  ;;  %v1778_v59 = vld [vmem:[%s2808_s18] sm:$0xff] }
 0x5c2   : > { %v2245_v61 = vpop.eup %2244  ;;  %v1448_v62 = vmul.f32 1.442695, %v1445_v60  ;;  %v1664_v63 = vpop.xlane.xlu1 %1663 }
 0x5c3   : > { %v1668_v0 = vsub.f32 %v1660_v35, %v1664_v63  ;;  %v1601_v1 = vsel %vm1019_vm6, %v2245_v61, 0.0 }
 0x5c4   : > { %2250 = vpow2.f32 %v1448_v62  ;;  %1602 = vadd.xlane.f32.xlu2 %v1601_v1  ;;  %v2247_v2 = vpop.eup %2246 }
 0x5c5   : > { %v1670_v3 = vmul.f32 1.442695, %v1668_v0  ;;  %v1498_v4 = vsel %vm1019_vm6, %v2247_v2, 0.0  ;;  %v2249_v5 = vpop.eup %2248 }
 0x5c6   : > { %1499 = vadd.xlane.f32.xlu1 %v1498_v4  ;;  %v1677_v7 = vsel %vm1019_vm6, %v2249_v5, 0.0 }
 0x5c7   : > { %2252 = vpow2.f32 %v1670_v3 }
 0x5ca   : > { %v2251_v6 = vpop.eup %2250 }
 0x5cb   : > { %v1453_v8 = vsel %vm1019_vm6, %v2251_v6, 0.0 }
 0x5cc   : > { %1678 = vadd.xlane.f32.xlu2 %v1677_v7 }
 0x5cd   : > { %v2253_v9 = vpop.eup %2252 }
 0x5ce   : > { %v1674_v11 = vsel %vm1019_vm6, %v2253_v9, 0.0  ;;  %1454 = vadd.xlane.f32.xlu1 %v1453_v8 }
 0x5cf   : > { %1675 = vadd.xlane.f32.xlu0 %v1674_v11 }
 0x617   : > { %v1452_v12 = vpop.xlane.xlu0 %1451 }
 0x618   : > { %2254 = vrcp.f32 %v1452_v12 }
 0x61e   : > { %v2255_v14 = vpop.eup %2254 }
 0x61f   : > { %v1458_v16 = vmul.f32 %v2255_v14, %v2239_v41 }
 0x621   : > { %2129 = vmatmul.msk.f32.vlgmr.msrb.gmra.mxu1 %vm1019_vm6, %v1458_v16 }
 0x62f   : > { %v1600_v20 = vpop.xlane.xlu2 %1599 }
 0x630   : > { %2256 = vrcp.f32 %v1600_v20  ;;  %v1497_v21 = vpop.xlane.xlu1 %1496 }
 0x631   : > { %2258 = vrcp.f32 %v1497_v21 }
 0x636   : > { %v2257_v22 = vpop.eup %2256 }
 0x637   : > { %v2259_v23 = vpop.eup %2258  ;;  %v1606_v25 = vmul.f32 %v2257_v22, %v2241_v51  ;;  %v1603_v26 = vpop.xlane.xlu2 %1602  ;;  %v1780_v51 = vld [vmem:[%s2808_s18 + $0x10] sm:$0xff] }
 0x638   : > { %v1503_v27 = vmul.f32 %v2259_v23, %v2243_v55  ;;  %2260 = vrcp.f32 %v1603_v26  ;;  %v2199_v55 = vld [vmem:[%s2805_s15] ss:$0 sm:$0xff]  ;;  %1801 = vmatpush.msra.mxu1 %v1780_v51 }
 0x639   : > { %2131 = vmatmul.msk.f32.vlgmr.msrb.gmra.mxu3 %vm1019_vm6, %v1606_v25  ;;  %v1500_v29 = vpop.xlane.xlu1 %1499  ;;  %v2200_v51 = vld [vmem:[%s2810_s20] ss:$0 sm:$0xff] }
 0x63a   : > { %2127 = vmatmul.msk.f32.vlgmr.msra.gmra.mxu2 %vm1019_vm6, %v1503_v27  ;;  %2262 = vrcp.f32 %v1500_v29  ;;  %1802 = vmatpush.msra.mxu1 %v1779_v19 }
 0x63c   : > { %1803 = vmatpush.msra.mxu1 %v1778_v59 }
 0x63e   : > { %v2261_v13 = vpop.eup %2260 }
 0x63f   : > { %v1607_v30 = vmul.f32 %v2261_v13, %v2245_v61  ;;  %v1679_v34 = vpop.xlane.xlu2 %1678 }
 0x640   : > { %v2263_v31 = vpop.eup %2262 }
 0x641   : > { %2132 = vmatmul.msk.f32.gmra.mxu3 %vm1019_vm6, %v1607_v30  ;;  %v1455_v15 = vpop.xlane.xlu1 %1454  ;;  %v1504_v33 = vmul.f32 %v2263_v31, %v2247_v2 }
 0x642   : > { %v1676_v32 = vpop.xlane.xlu0 %1675  ;;  %2264 = vrcp.f32 %v1455_v15 }
 0x643   : > { %2266 = vrcp.f32 %v1676_v32  ;;  %2128 = vmatmul.msk.f32.gmra.mxu2 %vm1019_vm6, %v1504_v33 }
 0x644   : > { %2268 = vrcp.f32 %v1679_v34 }
 0x648   : > { %v2265_v35 = vpop.eup %2264 }
 0x649   : > { %v2267_v36 = vpop.eup %2266  ;;  %v1459_v38 = vmul.f32 %v2265_v35, %v2251_v6 }
 0x64a   : > { %v1682_v39 = vmul.f32 %v2267_v36, %v2253_v9  ;;  %v2269_v40 = vpop.eup %2268 }
 0x64b   : > { %2130 = vmatmul.msk.f32.gmra.mxu1 %vm1019_vm6, %v1459_v38  ;;  %v1683_v41 = vmul.f32 %v2269_v40, %v2249_v5 }
 0x64c   : > { %2133 = vmatmul.msk.f32.vlgmr.msrb.gmra.mxu0 %vm1019_vm6, %v1682_v39 }
 0x654   : > { %2134 = vmatmul.msk.f32.gmra.mxu0 %vm1019_vm6, %v1683_v41 }
 0x69e   : > { %v1561_v46 = vpop.f32.mrf.mxu1 }
 0x6bc   : > { %v1635_v18 = vpop.f32.mrf.mxu3 }
 0x6bd   : > { %v1532_v17 = vpop.f32.mrf.mxu2 }
 0x6be   : > { %v1562_v47 = vadd.f32 %v1561_v46, %v1532_v17 }
 0x6c0   : > { %v1641_v48 = vadd.f32 %v1635_v18, %v1562_v47 }
 0x6c4   : > { %v1638_v61 = vpop.f32.mrf.mxu3 }
 0x6c6   : > { %v1535_v56 = vpop.f32.mrf.mxu2 }
 0x6c8   : > { %v1564_v49 = vpop.f32.mrf.mxu1 }
 0x6c9   : > { %v1711_v52 = vpop.f32.mrf.mxu0  ;;  %v1565_v57 = vadd.f32 %v1564_v49, %v1535_v56  ;;  %v2201_v49 = vld [vmem:[%s2811_s21] ss:$0 sm:$0xff]  ;;  %v1953_v56 = vld [vmem:[%s2812_s22 + $0x18] sm:$0xff] }
 0x6ca   : > { %v1717_v54 = vadd.f32 %v1711_v52, %v1641_v48  ;;  %1970 = vmatpush.msra.mxu2 %v1953_v56 }
 0x6cb   : > { %v1642_v63 = vadd.f32 %v1638_v61, %v1565_v57  ;;  %v1952_v57 = vld [vmem:[%s2812_s22 + $0x10] sm:$0xff] }
 0x6cc   : > { %v1723_v58 = vmul.f32 %v2198_v50, %v1717_v54  ;;  %1971 = vmatpush.msra.mxu2 %v1952_v57 }
 0x6ce   : > { %v1729_v60 = vadd.f32 %v2199_v55, %v1723_v58 }
 0x6d0   : > { %v1733_v62 = vmin.f32 %v1729_v60, 0.0  ;;  %vm1731_vm10 = vcmp.gt.f32.partialorder %v1729_v60, 0.0 }
 0x6d1   : > { %v1714_v0 = vpop.f32.mrf.mxu0 }
 0x6d2   : > { %v1735_v1 = vmul.f32 1.442695, %v1733_v62  ;;  %v1718_v2 = vadd.f32 %v1714_v0, %v1642_v63  ;;  %v1950_v62 = vld [vmem:[%s2812_s22] sm:$0xff] }
 0x6d4   : > { %2270 = vpow2.f32 %v1735_v1  ;;  %v1724_v3 = vmul.f32 %v2198_v50, %v1718_v2  ;;  %v1980_v1 = vld [vmem:[%s2814_s24 + $0x8] sm:$0xff] }
 0x6d6   : > { %v1730_v4 = vadd.f32 %v2199_v55, %v1724_v3 }
 0x6d8   : > { %v1734_v5 = vmin.f32 %v1730_v4, 0.0  ;;  %vm1732_vm11 = vcmp.gt.f32.partialorder %v1730_v4, 0.0 }
 0x6da   : > { %v2271_v6 = vpop.eup %2270  ;;  %v1737_v7 = vmul.f32 1.442695, %v1734_v5 }
 0x6db   : > { %v2135_v8 = vadd.f32 -1.0, %v2271_v6 }
 0x6dc   : > { %2272 = vpow2.f32 %v1737_v7 }
 0x6dd   : > { %v1741_v9 = vsel %vm1731_vm10, %v1729_v60, %v2135_v8  ;;  %v1951_v60 = vld [vmem:[%s2812_s22 + $0x8] sm:$0xff] }
 0x6de   : > { %v2718_v11 = vadd.f32 %v1741_v9, %v2615_v24  ;;  %v1811_v24 = vld [vmem:[%s2807_s17] sm:$0x1]  ;;  %1972 = vmatpush.msra.mxu2 %v1951_v60 }
 0x6e0   : > { %2137 = vmatmul.msk.f32.vlgmr.msrb.gmra.mxu2 %vm911_vm1, %v2718_v11 }
 0x6e1   : > { %1973 = vmatpush.msra.mxu2 %v1950_v62 }
 0x6e2   : > { %v2273_v12 = vpop.eup %2272 }
 0x6e3   : > { %v2136_v14 = vadd.f32 -1.0, %v2273_v12 }
 0x6e5   : > { %v1742_v16 = vsel %vm1732_vm11, %v1730_v4, %v2136_v14  ;;  %v2301_v4 = vmov 16.0  }
 0x6e6   : > { %v2723_v20 = vadd.f32 %v1742_v16, %v2620_v28 }
 0x6e8   : > { %2138 = vmatmul.msk.f32.gmra.mxu2 %vm911_vm1, %v2723_v20 }
 0x763   : > { %v1772_v21 = vpop.f32.mrf.mxu2 }
 0x764   : > { %2139 = vmatmul.msk.f32.vlgmr.msra.gmra.mxu1 %vm911_vm1, %v1772_v21 }
 0x76b   : > { %v1775_v22 = vpop.f32.mrf.mxu2 }
 0x76c   : > { %2140 = vmatmul.msk.f32.gmra.mxu1 %vm911_vm1, %v1775_v22  ;;  %2141 = vmatpush.xpose.msk.msra.mxu3 %vm911_vm1, %v1775_v22 }
 0x76d   : > { %1898 = vmatpush.msra.mxu0 %v1775_v22 }
 0x76f   : > { %1899 = vmatpush.msra.mxu0 %v1772_v21 }
 0x770   : > { %2142 = vmatpush.xpose.msk.msra.mxu3 %vm911_vm1, %v1772_v21 }
 0x773   : > { %2143 = vmatmul.msk.f32.vlgmr.msra.gmra.mxu3 %vm911_vm1, %v1811_v24 }
 0x774   : > { %1999 = vmatpush.msrb.mxu3 %v1980_v1 }
 0x7e1   : > { %v1805_v28 = vpop.f32.mrf.mxu1 }
 0x7e2   : > { %1837 = vperm.xlu0 %2185, %v1805_v28  }
 0x7e9   : > { %v1808_v23 = vpop.f32.mrf.mxu1 }
 0x7ea   : > { %1842 = vperm.xlu1 %2186, %v1808_v23  }
 0x7f6   : > { %v1832_v25 = vpop.f32.mrf.mxu3 }
 0x7f7   : > { %v1845_v26 = vperm.slane %v1832_v25, 0 }
 0x854   : > { %v1838_v27 = vpop.permute.xlu0 %1837 }
 0x855   : > { %v1846_v29 = vadd.f32 %v1845_v26, %v1838_v27 }
 0x857   : > { %vm1848_vm12 = vcmp.gt.f32.partialorder %v1846_v29, 0.0  ;;  %v1850_v13 = vmul.f32 0.01, %v1846_v29 }
 0x859   : > { %v1852_v30 = vsel %vm1848_vm12, %v1846_v29, %v1850_v13 }
 0x85a   : > { %v1854_v31 = vadd.f32 %v1852_v30, %v2547_v53 }
 0x85c   : > { %v1843_v15 = vpop.permute.xlu1 %1842  ;;  %v1856_v32 = vsel %vm1019_vm6, %v1854_v31, -inf }
 0x85d   : > { %v1847_v33 = vadd.f32 %v1845_v26, %v1843_v15  ;;  %1857 = vmax.xlane.f32.xlu2 %v1856_v32 }
 0x85f   : > { %vm1849_vm13 = vcmp.gt.f32.partialorder %v1847_v33, 0.0  ;;  %v1851_v34 = vmul.f32 0.01, %v1847_v33 }
 0x861   : > { %v1853_v35 = vsel %vm1849_vm13, %v1847_v33, %v1851_v34  ;;  %v2006_v33 = vld [vmem:[%s2816_s26] sm:$0xff] }
 0x862   : > { %v1855_v36 = vadd.f32 %v1853_v35, %v2555_v10  ;;  %2026 = vmatpush.msrb.mxu1 %v2006_v33  ;;  %v1954_v34 = vld [vmem:[%s2813_s23] sm:$0x1] }
 0x864   : > { %v1859_v38 = vsel %vm1019_vm6, %v1855_v36, -inf }
 0x865   : > { %1860 = vmax.xlane.f32.xlu2 %v1859_v38 }
 0x8d0   : > { %v1858_v39 = vpop.xlane.xlu2 %1857 }
 0x8d1   : > { %v1862_v40 = vsub.f32 %v1854_v31, %v1858_v39  ;;  %v1981_v39 = vld [vmem:[%s2815_s25] sm:$0x1] }
 0x8d3   : > { %v1864_v41 = vmul.f32 1.442695, %v1862_v40 }
 0x8d5   : > { %2274 = vpow2.f32 %v1864_v41 }
 0x8d8   : > { %v1861_v42 = vpop.xlane.xlu2 %1860 }
 0x8d9   : > { %v1863_v43 = vsub.f32 %v1855_v36, %v1861_v42 }
 0x8db   : > { %v2275_v53 = vpop.eup %2274  ;;  %v1866_v44 = vmul.f32 1.442695, %v1863_v43  ;;  %v2007_v43 = vld [vmem:[#allocation2] sm:$0x1] }
 0x8dc   : > { %v1868_v45 = vsel %vm1019_vm6, %v2275_v53, 0.0 }
 0x8dd   : > { %2276 = vpow2.f32 %v1866_v44  ;;  %1869 = vadd.xlane.f32.xlu2 %v1868_v45 }
 0x8e3   : > { %v2277_v46 = vpop.eup %2276 }
 0x8e4   : > { %v1871_v17 = vsel %vm1019_vm6, %v2277_v46, 0.0 }
 0x8e5   : > { %1872 = vadd.xlane.f32.xlu1 %v1871_v17 }
 0x950   : > { %v1870_v10 = vpop.xlane.xlu2 %1869 }
 0x951   : > { %2278 = vrcp.f32 %v1870_v10 }
 0x957   : > { %v2279_v47 = vpop.eup %2278 }
 0x958   : > { %v1876_v18 = vmul.f32 %v2279_v47, %v2275_v53  ;;  %v1873_v48 = vpop.xlane.xlu1 %1872 }
 0x959   : > { %2280 = vrcp.f32 %v1873_v48 }
 0x95a   : > { %2144 = vmatmul.msk.f32.vlgmr.msra.gmra.mxu0 %vm1019_vm6, %v1876_v18 }
 0x95f   : > { %v2281_v50 = vpop.eup %2280 }
 0x960   : > { %v1877_v37 = vmul.f32 %v2281_v50, %v2277_v46 }
 0x962   : > { %2145 = vmatmul.msk.f32.gmra.mxu0 %vm1019_vm6, %v1877_v37 }
 0x9d7   : > { %v1901_v52 = vpop.f32.mrf.mxu0 }
 0x9d8   : > { %v1911_v54 = vmul.f32 %v2200_v51, %v1901_v52 }
 0x9da   : > { %v1917_v55 = vadd.f32 %v2201_v49, %v1911_v54 }
 0x9dc   : > { %v1921_v19 = vmin.f32 %v1917_v55, 0.0  ;;  %vm1919_vm14 = vcmp.gt.f32.partialorder %v1917_v55, 0.0 }
 0x9de   : > { %v1923_v58 = vmul.f32 1.442695, %v1921_v19 }
 0x9df   : > { %v1904_v59 = vpop.f32.mrf.mxu0 }
 0x9e0   : > { %2282 = vpow2.f32 %v1923_v58  ;;  %v1912_v61 = vmul.f32 %v2200_v51, %v1904_v59 }
 0x9e1   : > { %2284 = vrcp.f32 %v2301_v4 }
 0x9e2   : > { %v1918_v63 = vadd.f32 %v2201_v49, %v1912_v61 }
 0x9e4   : > { %v1922_v0 = vmin.f32 %v1918_v63, 0.0  ;;  %vm1920_vm15 = vcmp.gt.f32.partialorder %v1918_v63, 0.0 }
 0x9e6   : > { %v2283_v2 = vpop.eup %2282  ;;  %v1925_v3 = vmul.f32 1.442695, %v1922_v0 }
 0x9e7   : > { %v2146_v5 = vadd.f32 -1.0, %v2283_v2  ;;  %v2285_v6 = vpop.eup %2284 }
 0x9e8   : > { %2286 = vpow2.f32 %v1925_v3  ;;  %v1943_v14 = vmul.f32 16.0, %v2285_v6  ;;  %vm1947_vm2 = vweird.f32 %v2285_v6 }
 0x9e9   : > { %v1929_v7 = vsel %vm1919_vm14, %v1917_v55, %v2146_v5 }
 0x9ea   : > { %v1931_v12 = vadd.f32 %v1929_v7, %v2718_v11  ;;  %v1944_v28 = vsub.f32 1.0, %v1943_v14 }
 0x9ec   : > { %v1933_v22 = vsel %vm911_vm1, %v1931_v12, 0.0  ;;  %v1945_v26 = vmul.f32 %v2285_v6, %v1944_v28 }
 0x9ee   : > { %v2287_v8 = vpop.eup %2286  ;;  %v1946_v13 = vadd.f32 %v2285_v6, %v1945_v26 }
 0x9ef   : > { %v2147_v9 = vadd.f32 -1.0, %v2287_v8 }
 0x9f0   : > { %v1948_v11 = vsel %vm1947_vm2, %v2285_v6, %v1946_v13 }
 0x9f1   : > { %v1930_v16 = vsel %vm1920_vm15, %v1918_v63, %v2147_v9 }
 0x9f2   : > { %v1932_v21 = vadd.f32 %v1930_v16, %v2723_v20  ;;  %v1979_v20 = vld [vmem:[%s2814_s24] sm:$0xff] }
 0x9f3   : > { %2000 = vmatpush.msrb.mxu3 %v1979_v20 }
 0x9f4   : > { %v1934_v24 = vsel %vm911_vm1, %v1932_v21, 0.0 }
 0x9f5   : > { %v1935_v23 = vadd.f32 %v1934_v24, %v1933_v22 }
 0x9f7   : > { %v1936_v25 = vrot.slane %v1935_v23, 4 }
 0x9f9   : > { %v1937_v27 = vadd.f32 %v1936_v25, %v1935_v23 }
 0x9fb   : > { %v1938_v29 = vrot.slane %v1937_v27, 2 }
 0x9fd   : > { %v1939_v30 = vadd.f32 %v1938_v29, %v1937_v27 }
 0x9ff   : > { %v1940_v31 = vrot.slane %v1939_v30, 1 }
 0xa01   : > { %v1941_v15 = vadd.f32 %v1940_v31, %v1939_v30 }
 0xa03   : > { %v1949_v32 = vmul.f32 %v1948_v11, %v1941_v15 }
 0xa05   : > { %2148 = vmatmul.msk.f32.vlgmr.msra.gmra.mxu2 %vm911_vm1, %v1949_v32  ;;  %vm2031_vm1 = vcmask 0  }
 0xa88   : > { %v1975_v35 = vpop.f32.mrf.mxu2 }
 0xa89   : > { %v1976_v36 = vadd.f32 %v1975_v35, %v1954_v34 }
 0xa8b   : > { %v1978_v38 = vmax.f32 %v1976_v36, 0.0 }
 0xa8d   : > { %2149 = vmatmul.msk.f32.vlgmr.msrb.gmra.mxu3 %vm1019_vm6, %v1978_v38 }
 0xb10   : > { %v2002_v40 = vpop.f32.mrf.mxu3 }
 0xb11   : > { %v2003_v41 = vadd.f32 %v2002_v40, %v1981_v39 }
 0xb13   : > { %v2005_v42 = vmax.f32 %v2003_v41, 0.0 }
 0xb15   : > { %2150 = vmatmul.msk.f32.vlgmr.msrb.gmra.mxu1 %vm877_vm0, %v2005_v42 }
 0xb92   : > { %v2028_v53 = vpop.f32.mrf.mxu1 }
 0xb93   : > { %v2029_v44 = vadd.f32 %v2028_v53, %v2007_v43 }
 0xb95   : > { %2032 = vst.msk [vmem:[%s863_s3] sm:$0x1] %vm2031_vm1, %v2029_v44 }
 0xb96 PF: > { %s40_s5 = sadd.s32 1, %s2294_s5  }
 0xb97   : > { %p37_p4 = scmp.ge.s32.totalorder %s40_s5, 6  }
 0xb99   :  { %39 = sbr.rel (!%p37_p4) target bundleno = 14 (0xe), region = 165 }

</bundles_post_ra>
